<compile_context>
chip_gen: v7x
topology: tpu7x:2x2x1
jax: 0.10.0
libtpu: 0.0.40
codegen_flags: <defaults>
</compile_context>

<pallas_src>
import functools

import jax
import jax.numpy as jnp
from jax.experimental import pallas as pl
from jax.experimental.pallas import tpu as pltpu


# ----------------------------------------------------------------------------
# helpers
# ----------------------------------------------------------------------------
def _round_up(x: int, m: int) -> int:
    return -(-x // m) * m


def _pad2d(a, rows: int, cols: int):
    return jnp.pad(a, ((0, rows - a.shape[0]), (0, cols - a.shape[1])))


# ----------------------------------------------------------------------------
# Fused Pallas kernel: 1x1-conv projection + full FFN chain.
#   refs = (x, proj_w, proj_b, [hidden_w, hidden_b]*, last_w, last_b,
#           o_ref, h_scratch)
#   x:        (TM, Cp)  f32          proj_w: (Cp, Hp)  bf16   proj_b: (1, Hp) f32
#   hidden_w: (Kp, Np)  bf16         hidden_b: (1, Np) f32
#   last_w:   (Kp_last, TN) bf16     last_b: (1, TN)  f32
#   o:        (TM, TN)  f32          h_scratch: (TM, Kp_last) f32 (VMEM)
# All lane dims pre-padded to multiples of 128 (zero padding is preserved
# through bias+ReLU: zero weight rows/cols, zero bias, ReLU(0)=0).
# Grid = (row tiles, vocab tiles).  The pre-logit activation is computed only
# at j == 0 and cached in VMEM scratch, then reused for every vocab tile.
# ----------------------------------------------------------------------------
def _fused_caption_kernel(*refs, n_layers: int):
    x_ref, proj_w_ref, proj_b_ref = refs[0], refs[1], refs[2]
    o_ref, h_scratch = refs[-2], refs[-1]
    layer_refs = refs[3:-2]
    hidden_refs = layer_refs[:-2]                 # (n_layers - 1) (w, b) pairs
    last_w_ref, last_b_ref = layer_refs[-2], layer_refs[-1]

    @pl.when(pl.program_id(1) == 0)
    def _():
        # input_proj (1x1 conv == per-row matmul over channels), bias fused.
        h = (jnp.dot(x_ref[...].astype(jnp.bfloat16), proj_w_ref[...],
                     preferred_element_type=jnp.float32)
             + proj_b_ref[...])
        # TODO(synk): the Transformer decoder would run here; `h` stands in
        #             for hs (decoder not in the provided source).
        for i in range(n_layers - 1):
            w_ref = hidden_refs[2 * i]
            b_ref = hidden_refs[2 * i + 1]
            h = (jnp.dot(h.astype(jnp.bfloat16), w_ref[...],
                         preferred_element_type=jnp.float32)
                 + b_ref[...])
            h = jnp.maximum(h, 0.0)               # f32 epilogue
        h_scratch[...] = h

    # Final (vocab) projection for this (row tile, vocab tile).
    logits = (jnp.dot(h_scratch[...].astype(jnp.bfloat16), last_w_ref[...],
                      preferred_element_type=jnp.float32)
              + last_b_ref[...])
    o_ref[...] = logits.astype(o_ref.dtype)


def _fused_caption_ffn(x_rows, padded, *, single_buffer_weights):
    """x_rows: (M, C_in) f32 rows (channels last).  Returns (M, Vp) f32 logits."""
    M, c_in = x_rows.shape
    proj_w, proj_b = padded["proj_w"], padded["proj_b"]
    ffn_w, ffn_b = padded["ffn_w"], padded["ffn_b"]
    n_layers = len(ffn_w)

    Cp = proj_w.shape[0]
    Kp_last = ffn_w[-1].shape[0]
    Vp = ffn_w[-1].shape[1]

    # ---- row tiling (parallel axis; keep >= 2 tiles so both v7x TCs work) ----
    if M >= 512:
        TM = 256
    elif M >= 16:
        TM = min(256, _round_up(-(-M // 2), 8))
    else:
        TM = _round_up(max(M, 1), 8)
    M_pad = _round_up(M, TM)
    nM = M_pad // TM

    # ---- vocab tiling (stream the big logits weight when vocab is large) ----
    if Vp > 2048:
        TN = 128
        for cand in (1024, 512, 256):
            if Vp % cand == 0:
                TN = cand
                break
    else:
        TN = Vp
    nN = Vp // TN

    # Pad activations only when needed (avoid extra HBM copies).
    if M_pad != M or Cp != c_in:
        x_p = jnp.pad(x_rows, ((0, M_pad - M), (0, Cp - c_in)))
    else:
        x_p = x_rows

    buf1 = pl.Buffered(1) if single_buffer_weights else None

    def const_spec(shape):
        if buf1 is not None:
            return pl.BlockSpec(shape, lambda i, j: (0, 0), pipeline_mode=buf1)
        return pl.BlockSpec(shape, lambda i, j: (0, 0))

    in_specs = [pl.BlockSpec((TM, Cp), lambda i, j: (i, 0)),       # activations
                const_spec(proj_w.shape), const_spec(proj_b.shape)]
    operands = [x_p, proj_w, proj_b]
    for w, b in zip(ffn_w[:-1], ffn_b[:-1]):                       # resident weights
        in_specs += [const_spec(w.shape), const_spec(b.shape)]
        operands += [w, b]
    if nN == 1:                                                    # small vocab: resident
        in_specs += [const_spec(ffn_w[-1].shape), const_spec(ffn_b[-1].shape)]
    else:                                                          # large vocab: streamed
        in_specs += [pl.BlockSpec((Kp_last, TN), lambda i, j: (0, j)),
                     pl.BlockSpec((1, TN), lambda i, j: (0, j))]
    operands += [ffn_w[-1], ffn_b[-1]]

    out_specs = pl.BlockSpec((TM, TN), lambda i, j: (i, j))

    # ---- VMEM budget from the real footprint ----
    w_buf = 1 if single_buffer_weights else 2
    resident = (proj_w.size * 2 + proj_b.size * 4
                + sum(w.size * 2 + b.size * 4
                      for w, b in zip(ffn_w[:-1], ffn_b[:-1])))
    if nN == 1:
        resident += ffn_w[-1].size * 2 + ffn_b[-1].size * 4
        streamed_last = 0
    else:
        streamed_last = 2 * (Kp_last * TN * 2 + TN * 4)
    act_bufs = 2 * TM * Cp * 4 + 2 * TM * TN * 4 + TM * Kp_last * 4
    vmem_bytes = int((w_buf * resident + streamed_last + act_bufs) * 1.25)
    vmem_bytes = max(16 * 1024 * 1024, min(vmem_bytes, 56 * 1024 * 1024))

    out = pl.pallas_call(
        functools.partial(_fused_caption_kernel, n_layers=n_layers),
        grid=(nM, nN),
        in_specs=in_specs,
        out_specs=out_specs,
        out_shape=jax.ShapeDtypeStruct((M_pad, Vp), jnp.float32),
        scratch_shapes=[pltpu.VMEM((TM, Kp_last), jnp.float32)],
        compiler_params=pltpu.CompilerParams(
            dimension_semantics=("parallel", "arbitrary"),
            vmem_limit_bytes=vmem_bytes,
        ),
    )(*operands)
    return out[:M]


def fused_caption_ffn(x_rows, padded):
    try:
        return _fused_caption_ffn(x_rows, padded, single_buffer_weights=True)
    except Exception:
        # Fallback if this JAX build rejects pipeline_mode=pl.Buffered(1).
        return _fused_caption_ffn(x_rows, padded, single_buffer_weights=False)


# ----------------------------------------------------------------------------
# Caption forward (layout glue in plain JAX, all compute in the fused kernel)
# ----------------------------------------------------------------------------
def caption_forward(padded, src, target, target_mask):
    """src: (B, C_in, Hf, Wf) NCHW backbone feature map (f32)
    target: (B, T) int32 tokens; target_mask: (T, T) — consumed by the
    (unavailable) decoder; only T is used here (see TODO at top).
    Returns: (B, T, vocab) f32 logits, matching `out = self.ffn(hs.permute(1,0,2))`.
    """
    B, C_in, Hf, Wf = src.shape
    T = target.shape[1]
    assert Hf * Wf >= T, "decoder stand-in needs Hf*Wf >= T"

    # NCHW -> channels-last rows; first T spatial positions per batch element
    # (decoder stand-in).  hs.permute(1,0,2) row order == this (B, T) order.
    x_rows = (jnp.transpose(src, (0, 2, 3, 1))
              .reshape(B, Hf * Wf, C_in)[:, :T, :]
              .reshape(B * T, C_in))

    logits = fused_caption_ffn(x_rows, padded)            # (B*T, Vp)
    vocab = padded["vocab"]
    return logits[:, :vocab].reshape(B, T, vocab)


# ----------------------------------------------------------------------------
# Parameters (shapes follow the module __init__) + one-time lane padding
# ----------------------------------------------------------------------------
def init_params(key, num_channels, hidden_dim, ffn_hidden, vocab_size, num_layers):
    keys = jax.random.split(key, 2 + 2 * num_layers)

    # input_proj: Conv2d(num_channels, hidden_dim, kernel_size=1)
    # PyTorch weight (hidden, C_in, 1, 1) -> stored here as (C_in, hidden).
    proj_w = 0.05 * jax.random.normal(keys[0], (num_channels, hidden_dim), jnp.float32)
    proj_b = 0.05 * jax.random.normal(keys[1], (hidden_dim,), jnp.float32)

    # FFN(hidden_dim, ffn_hidden, vocab_size, num_layers):
    #   dims: [hidden_dim] + [ffn_hidden]*(num_layers-1) + [vocab_size]
    h = [ffn_hidden] * (num_layers - 1)
    in_dims = [hidden_dim] + h
    out_dims = h + [vocab_size]
    ffn_w, ffn_b = [], []
    for li, (n_in, n_out) in enumerate(zip(in_dims, out_dims)):
        ffn_w.append(0.05 * jax.random.normal(keys[2 + 2 * li], (n_in, n_out), jnp.float32))
        ffn_b.append(0.05 * jax.random.normal(keys[3 + 2 * li], (n_out,), jnp.float32))

    return {"proj_w": proj_w, "proj_b": proj_b, "ffn_w": ffn_w, "ffn_b": ffn_b}


def prepare_padded_params(params, lane: int = 128):
    """Zero-pad every lane dim to a multiple of 128; weights in bf16, biases f32."""
    proj_w, proj_b = params["proj_w"], params["proj_b"]
    c_in, hidden = proj_w.shape
    Cp, Hp = _round_up(c_in, lane), _round_up(hidden, lane)

    padded = {
        "proj_w": _pad2d(proj_w, Cp, Hp).astype(jnp.bfloat16),
        "proj_b": _pad2d(proj_b.reshape(1, -1), 1, Hp),            # f32 bias
        "ffn_w": [],
        "ffn_b": [],
        "vocab": params["ffn_w"][-1].shape[1],
    }
    for w, b in zip(params["ffn_w"], params["ffn_b"]):
        kp = _round_up(w.shape[0], lane)
        np_ = _round_up(w.shape[1], lane)
        padded["ffn_w"].append(_pad2d(w, kp, np_).astype(jnp.bfloat16))
        padded["ffn_b"].append(_pad2d(b.reshape(1, -1), 1, np_))   # f32 bias
    return padded


if __name__ == "__main__":
    # Small, module-consistent shapes.
    B = 2            # batch
    C_IN = 8         # encoder.num_channels (backbone output channels)
    HF = WF = 4      # backbone feature-map spatial size
    HIDDEN = 32      # hidden_dimensions
    FFN_HIDDEN = 64  # FFN input_dim (its hidden width)
    VOCAB = 48       # vocab_size
    NUM_LAYERS = 6   # FFN num_layers
    T = 8            # target caption length

    key = jax.random.PRNGKey(0)
    k_src, k_tgt, k_par = jax.random.split(key, 3)

    src = jax.random.normal(k_src, (B, C_IN, HF, WF), jnp.float32)          # backbone features
    target = jax.random.randint(k_tgt, (B, T), 0, VOCAB).astype(jnp.int32)  # token ids
    target_mask = jnp.triu(jnp.ones((T, T), jnp.bool_), k=1)                # causal mask

    params = init_params(k_par, C_IN, HIDDEN, FFN_HIDDEN, VOCAB, NUM_LAYERS)
    padded = prepare_padded_params(params)

    out = caption_forward(padded, src, target, target_mask)
    out = jax.block_until_ready(out)
    assert out.shape == (B, T, VOCAB), out.shape
    assert out.dtype == jnp.float32

    # Cross-check the fused bf16-MXU Pallas path against a pure-JAX f32 reference.
    x_rows = (jnp.transpose(src, (0, 2, 3, 1))
              .reshape(B, HF * WF, C_IN)[:, :T, :]
              .reshape(B * T, C_IN))
    ref = x_rows @ params["proj_w"] + params["proj_b"]
    for i, (w, b) in enumerate(zip(params["ffn_w"], params["ffn_b"])):
        ref = ref @ w + b
        if i < NUM_LAYERS - 1:
            ref = jnp.maximum(ref, 0.0)
    ref = ref.reshape(B, T, VOCAB)
    assert bool(jnp.all(jnp.isfinite(out)))
    assert jnp.allclose(out, ref, atol=2e-2, rtol=2e-2), float(jnp.max(jnp.abs(out - ref)))

    print("KERNEL_OK")
</pallas_src>

<mosaic_0001>
module attributes {stable_mosaic.version = 11 : i64} {
  func.func @_fused_caption_kernel(%arg0: i32, %arg1: i32, %arg2: memref<8x128xf32, #tpu.memory_space<vmem>>, %arg3: memref<128x128xbf16, #tpu.memory_space<vmem>>, %arg4: memref<1x128xf32, #tpu.memory_space<vmem>>, %arg5: memref<128x128xbf16, #tpu.memory_space<vmem>>, %arg6: memref<1x128xf32, #tpu.memory_space<vmem>>, %arg7: memref<128x128xbf16, #tpu.memory_space<vmem>>, %arg8: memref<1x128xf32, #tpu.memory_space<vmem>>, %arg9: memref<128x128xbf16, #tpu.memory_space<vmem>>, %arg10: memref<1x128xf32, #tpu.memory_space<vmem>>, %arg11: memref<128x128xbf16, #tpu.memory_space<vmem>>, %arg12: memref<1x128xf32, #tpu.memory_space<vmem>>, %arg13: memref<128x128xbf16, #tpu.memory_space<vmem>>, %arg14: memref<1x128xf32, #tpu.memory_space<vmem>>, %arg15: memref<128x128xbf16, #tpu.memory_space<vmem>>, %arg16: memref<1x128xf32, #tpu.memory_space<vmem>>, %arg17: memref<8x128xf32, #tpu.memory_space<vmem>>, %arg18: memref<8x128xf32, #tpu.memory_space<vmem>>) attributes {dimension_semantics = [#tpu.dimension_semantics<parallel>, #tpu.dimension_semantics<arbitrary>], iteration_bounds = array<i64: 2, 1>, scalar_prefetch = 0 : i64, scratch_operands = 1 : i64, tpu.core_type = #tpu.core_type<tc>, window_params = [{transform_indices = @transform_0, window_bounds = array<i64: 8, 128>}, {pipeline_mode = #tpu.pipeline_mode<synchronous>, transform_indices = @transform_1, window_bounds = array<i64: 128, 128>}, {pipeline_mode = #tpu.pipeline_mode<synchronous>, transform_indices = @transform_2, window_bounds = array<i64: 1, 128>}, {pipeline_mode = #tpu.pipeline_mode<synchronous>, transform_indices = @transform_3, window_bounds = array<i64: 128, 128>}, {pipeline_mode = #tpu.pipeline_mode<synchronous>, transform_indices = @transform_4, window_bounds = array<i64: 1, 128>}, {pipeline_mode = #tpu.pipeline_mode<synchronous>, transform_indices = @transform_5, window_bounds = array<i64: 128, 128>}, {pipeline_mode = #tpu.pipeline_mode<synchronous>, transform_indices = @transform_6, window_bounds = array<i64: 1, 128>}, {pipeline_mode = #tpu.pipeline_mode<synchronous>, transform_indices = @transform_7, window_bounds = array<i64: 128, 128>}, {pipeline_mode = #tpu.pipeline_mode<synchronous>, transform_indices = @transform_8, window_bounds = array<i64: 1, 128>}, {pipeline_mode = #tpu.pipeline_mode<synchronous>, transform_indices = @transform_9, window_bounds = array<i64: 128, 128>}, {pipeline_mode = #tpu.pipeline_mode<synchronous>, transform_indices = @transform_10, window_bounds = array<i64: 1, 128>}, {pipeline_mode = #tpu.pipeline_mode<synchronous>, transform_indices = @transform_11, window_bounds = array<i64: 128, 128>}, {pipeline_mode = #tpu.pipeline_mode<synchronous>, transform_indices = @transform_12, window_bounds = array<i64: 1, 128>}, {pipeline_mode = #tpu.pipeline_mode<synchronous>, transform_indices = @transform_13, window_bounds = array<i64: 128, 128>}, {pipeline_mode = #tpu.pipeline_mode<synchronous>, transform_indices = @transform_14, window_bounds = array<i64: 1, 128>}, {transform_indices = @transform_15, window_bounds = array<i64: 8, 128>}]} {
    %c0_i32 = arith.constant 0 : i32
    %0 = arith.cmpi eq, %arg1, %c0_i32 : i32
    %1 = arith.extui %0 : i1 to i32
    %c0_i32_0 = arith.constant 0 : i32
    %2 = arith.cmpi ne, %1, %c0_i32_0 : i32
    scf.if %2 {
      %c0_8 = arith.constant 0 : index
      %c0_9 = arith.constant 0 : index
      %11 = vector.load %arg2[%c0_8, %c0_9] : memref<8x128xf32, #tpu.memory_space<vmem>>, vector<8x128xf32>
      %12 = arith.truncf %11 : vector<8x128xf32> to vector<8x128xbf16>
      %c0_10 = arith.constant 0 : index
      %c0_11 = arith.constant 0 : index
      %13 = vector.load %arg3[%c0_10, %c0_11] : memref<128x128xbf16, #tpu.memory_space<vmem>>, vector<128x128xbf16>
      %cst_12 = arith.constant dense<0.000000e+00> : vector<8x128xf32>
      %14 = tpu.matmul %12, %13, %cst_12 {dimension_numbers = #tpu.dot_dimension_numbers<[1], [0], [0], [1], [0, 0, 1, 1], [], []>} : vector<8x128xbf16>, vector<128x128xbf16>, vector<8x128xf32> -> vector<8x128xf32>
      %c0_13 = arith.constant 0 : index
      %c0_14 = arith.constant 0 : index
      %15 = vector.load %arg4[%c0_13, %c0_14] : memref<1x128xf32, #tpu.memory_space<vmem>>, vector<1x128xf32>
      %16 = vector.broadcast %15 : vector<1x128xf32> to vector<8x128xf32>
      %17 = arith.addf %14, %16 : vector<8x128xf32>
      %18 = arith.truncf %17 : vector<8x128xf32> to vector<8x128xbf16>
      %c0_15 = arith.constant 0 : index
      %c0_16 = arith.constant 0 : index
      %19 = vector.load %arg5[%c0_15, %c0_16] : memref<128x128xbf16, #tpu.memory_space<vmem>>, vector<128x128xbf16>
      %cst_17 = arith.constant dense<0.000000e+00> : vector<8x128xf32>
      %20 = tpu.matmul %18, %19, %cst_17 {dimension_numbers = #tpu.dot_dimension_numbers<[1], [0], [0], [1], [0, 0, 1, 1], [], []>} : vector<8x128xbf16>, vector<128x128xbf16>, vector<8x128xf32> -> vector<8x128xf32>
      %c0_18 = arith.constant 0 : index
      %c0_19 = arith.constant 0 : index
      %21 = vector.load %arg6[%c0_18, %c0_19] : memref<1x128xf32, #tpu.memory_space<vmem>>, vector<1x128xf32>
      %22 = vector.broadcast %21 : vector<1x128xf32> to vector<8x128xf32>
      %23 = arith.addf %20, %22 : vector<8x128xf32>
      %cst_20 = arith.constant 0.000000e+00 : f32
      %24 = vector.broadcast %cst_20 : f32 to vector<8x128xf32>
      %25 = arith.maximumf %23, %24 : vector<8x128xf32>
      %26 = arith.truncf %25 : vector<8x128xf32> to vector<8x128xbf16>
      %c0_21 = arith.constant 0 : index
      %c0_22 = arith.constant 0 : index
      %27 = vector.load %arg7[%c0_21, %c0_22] : memref<128x128xbf16, #tpu.memory_space<vmem>>, vector<128x128xbf16>
      %cst_23 = arith.constant dense<0.000000e+00> : vector<8x128xf32>
      %28 = tpu.matmul %26, %27, %cst_23 {dimension_numbers = #tpu.dot_dimension_numbers<[1], [0], [0], [1], [0, 0, 1, 1], [], []>} : vector<8x128xbf16>, vector<128x128xbf16>, vector<8x128xf32> -> vector<8x128xf32>
      %c0_24 = arith.constant 0 : index
      %c0_25 = arith.constant 0 : index
      %29 = vector.load %arg8[%c0_24, %c0_25] : memref<1x128xf32, #tpu.memory_space<vmem>>, vector<1x128xf32>
      %30 = vector.broadcast %29 : vector<1x128xf32> to vector<8x128xf32>
      %31 = arith.addf %28, %30 : vector<8x128xf32>
      %cst_26 = arith.constant 0.000000e+00 : f32
      %32 = vector.broadcast %cst_26 : f32 to vector<8x128xf32>
      %33 = arith.maximumf %31, %32 : vector<8x128xf32>
      %34 = arith.truncf %33 : vector<8x128xf32> to vector<8x128xbf16>
      %c0_27 = arith.constant 0 : index
      %c0_28 = arith.constant 0 : index
      %35 = vector.load %arg9[%c0_27, %c0_28] : memref<128x128xbf16, #tpu.memory_space<vmem>>, vector<128x128xbf16>
      %cst_29 = arith.constant dense<0.000000e+00> : vector<8x128xf32>
      %36 = tpu.matmul %34, %35, %cst_29 {dimension_numbers = #tpu.dot_dimension_numbers<[1], [0], [0], [1], [0, 0, 1, 1], [], []>} : vector<8x128xbf16>, vector<128x128xbf16>, vector<8x128xf32> -> vector<8x128xf32>
      %c0_30 = arith.constant 0 : index
      %c0_31 = arith.constant 0 : index
      %37 = vector.load %arg10[%c0_30, %c0_31] : memref<1x128xf32, #tpu.memory_space<vmem>>, vector<1x128xf32>
      %38 = vector.broadcast %37 : vector<1x128xf32> to vector<8x128xf32>
      %39 = arith.addf %36, %38 : vector<8x128xf32>
      %cst_32 = arith.constant 0.000000e+00 : f32
      %40 = vector.broadcast %cst_32 : f32 to vector<8x128xf32>
      %41 = arith.maximumf %39, %40 : vector<8x128xf32>
      %42 = arith.truncf %41 : vector<8x128xf32> to vector<8x128xbf16>
      %c0_33 = arith.constant 0 : index
      %c0_34 = arith.constant 0 : index
      %43 = vector.load %arg11[%c0_33, %c0_34] : memref<128x128xbf16, #tpu.memory_space<vmem>>, vector<128x128xbf16>
      %cst_35 = arith.constant dense<0.000000e+00> : vector<8x128xf32>
      %44 = tpu.matmul %42, %43, %cst_35 {dimension_numbers = #tpu.dot_dimension_numbers<[1], [0], [0], [1], [0, 0, 1, 1], [], []>} : vector<8x128xbf16>, vector<128x128xbf16>, vector<8x128xf32> -> vector<8x128xf32>
      %c0_36 = arith.constant 0 : index
      %c0_37 = arith.constant 0 : index
      %45 = vector.load %arg12[%c0_36, %c0_37] : memref<1x128xf32, #tpu.memory_space<vmem>>, vector<1x128xf32>
      %46 = vector.broadcast %45 : vector<1x128xf32> to vector<8x128xf32>
      %47 = arith.addf %44, %46 : vector<8x128xf32>
      %cst_38 = arith.constant 0.000000e+00 : f32
      %48 = vector.broadcast %cst_38 : f32 to vector<8x128xf32>
      %49 = arith.maximumf %47, %48 : vector<8x128xf32>
      %50 = arith.truncf %49 : vector<8x128xf32> to vector<8x128xbf16>
      %c0_39 = arith.constant 0 : index
      %c0_40 = arith.constant 0 : index
      %51 = vector.load %arg13[%c0_39, %c0_40] : memref<128x128xbf16, #tpu.memory_space<vmem>>, vector<128x128xbf16>
      %cst_41 = arith.constant dense<0.000000e+00> : vector<8x128xf32>
      %52 = tpu.matmul %50, %51, %cst_41 {dimension_numbers = #tpu.dot_dimension_numbers<[1], [0], [0], [1], [0, 0, 1, 1], [], []>} : vector<8x128xbf16>, vector<128x128xbf16>, vector<8x128xf32> -> vector<8x128xf32>
      %c0_42 = arith.constant 0 : index
      %c0_43 = arith.constant 0 : index
      %53 = vector.load %arg14[%c0_42, %c0_43] : memref<1x128xf32, #tpu.memory_space<vmem>>, vector<1x128xf32>
      %54 = vector.broadcast %53 : vector<1x128xf32> to vector<8x128xf32>
      %55 = arith.addf %52, %54 : vector<8x128xf32>
      %cst_44 = arith.constant 0.000000e+00 : f32
      %56 = vector.broadcast %cst_44 : f32 to vector<8x128xf32>
      %57 = arith.maximumf %55, %56 : vector<8x128xf32>
      %c0_45 = arith.constant 0 : index
      %c0_46 = arith.constant 0 : index
      %58 = vector.load %arg18[%c0_45, %c0_46] : memref<8x128xf32, #tpu.memory_space<vmem>>, vector<8x128xf32>
      tpu.vector_store %arg18[%c0_45, %c0_46], %57 {strides = array<i32>} : memref<8x128xf32, #tpu.memory_space<vmem>>, vector<8x128xf32>,
    } else {
    }
    %c0 = arith.constant 0 : index
    %c0_1 = arith.constant 0 : index
    %3 = vector.load %arg18[%c0, %c0_1] : memref<8x128xf32, #tpu.memory_space<vmem>>, vector<8x128xf32>
    %4 = arith.truncf %3 : vector<8x128xf32> to vector<8x128xbf16>
    %c0_2 = arith.constant 0 : index
    %c0_3 = arith.constant 0 : index
    %5 = vector.load %arg15[%c0_2, %c0_3] : memref<128x128xbf16, #tpu.memory_space<vmem>>, vector<128x128xbf16>
    %cst = arith.constant dense<0.000000e+00> : vector<8x128xf32>
    %6 = tpu.matmul %4, %5, %cst {dimension_numbers = #tpu.dot_dimension_numbers<[1], [0], [0], [1], [0, 0, 1, 1], [], []>} : vector<8x128xbf16>, vector<128x128xbf16>, vector<8x128xf32> -> vector<8x128xf32>
    %c0_4 = arith.constant 0 : index
    %c0_5 = arith.constant 0 : index
    %7 = vector.load %arg16[%c0_4, %c0_5] : memref<1x128xf32, #tpu.memory_space<vmem>>, vector<1x128xf32>
    %8 = vector.broadcast %7 : vector<1x128xf32> to vector<8x128xf32>
    %9 = arith.addf %6, %8 : vector<8x128xf32>
    %c0_6 = arith.constant 0 : index
    %c0_7 = arith.constant 0 : index
    %10 = vector.load %arg17[%c0_6, %c0_7] : memref<8x128xf32, #tpu.memory_space<vmem>>, vector<8x128xf32>
    tpu.vector_store %arg17[%c0_6, %c0_7], %9 {strides = array<i32>} : memref<8x128xf32, #tpu.memory_space<vmem>>, vector<8x128xf32>,
    return
  }
  func.func @transform_0(%arg0: i32, %arg1: i32) -> (i32, i32) {
    %c0_i32 = arith.constant 0 : i32
    %c0_i32_0 = arith.constant 0 : i32
    return %arg0, %c0_i32 : i32, i32
  }
  func.func @transform_1(%arg0: i32, %arg1: i32) -> (i32, i32) {
    %c0_i32 = arith.constant 0 : i32
    %c0_i32_0 = arith.constant 0 : i32
    %c0_i32_1 = arith.constant 0 : i32
    return %c0_i32, %c0_i32_0 : i32, i32
  }
  func.func @transform_2(%arg0: i32, %arg1: i32) -> (i32, i32) {
    %c0_i32 = arith.constant 0 : i32
    %c0_i32_0 = arith.constant 0 : i32
    %c0_i32_1 = arith.constant 0 : i32
    return %c0_i32, %c0_i32_0 : i32, i32
  }
  func.func @transform_3(%arg0: i32, %arg1: i32) -> (i32, i32) {
    %c0_i32 = arith.constant 0 : i32
    %c0_i32_0 = arith.constant 0 : i32
    %c0_i32_1 = arith.constant 0 : i32
    return %c0_i32, %c0_i32_0 : i32, i32
  }
  func.func @transform_4(%arg0: i32, %arg1: i32) -> (i32, i32) {
    %c0_i32 = arith.constant 0 : i32
    %c0_i32_0 = arith.constant 0 : i32
    %c0_i32_1 = arith.constant 0 : i32
    return %c0_i32, %c0_i32_0 : i32, i32
  }
  func.func @transform_5(%arg0: i32, %arg1: i32) -> (i32, i32) {
    %c0_i32 = arith.constant 0 : i32
    %c0_i32_0 = arith.constant 0 : i32
    %c0_i32_1 = arith.constant 0 : i32
    return %c0_i32, %c0_i32_0 : i32, i32
  }
  func.func @transform_6(%arg0: i32, %arg1: i32) -> (i32, i32) {
    %c0_i32 = arith.constant 0 : i32
    %c0_i32_0 = arith.constant 0 : i32
    %c0_i32_1 = arith.constant 0 : i32
    return %c0_i32, %c0_i32_0 : i32, i32
  }
  func.func @transform_7(%arg0: i32, %arg1: i32) -> (i32, i32) {
    %c0_i32 = arith.constant 0 : i32
    %c0_i32_0 = arith.constant 0 : i32
    %c0_i32_1 = arith.constant 0 : i32
    return %c0_i32, %c0_i32_0 : i32, i32
  }
  func.func @transform_8(%arg0: i32, %arg1: i32) -> (i32, i32) {
    %c0_i32 = arith.constant 0 : i32
    %c0_i32_0 = arith.constant 0 : i32
    %c0_i32_1 = arith.constant 0 : i32
    return %c0_i32, %c0_i32_0 : i32, i32
  }
  func.func @transform_9(%arg0: i32, %arg1: i32) -> (i32, i32) {
    %c0_i32 = arith.constant 0 : i32
    %c0_i32_0 = arith.constant 0 : i32
    %c0_i32_1 = arith.constant 0 : i32
    return %c0_i32, %c0_i32_0 : i32, i32
  }
  func.func @transform_10(%arg0: i32, %arg1: i32) -> (i32, i32) {
    %c0_i32 = arith.constant 0 : i32
    %c0_i32_0 = arith.constant 0 : i32
    %c0_i32_1 = arith.constant 0 : i32
    return %c0_i32, %c0_i32_0 : i32, i32
  }
  func.func @transform_11(%arg0: i32, %arg1: i32) -> (i32, i32) {
    %c0_i32 = arith.constant 0 : i32
    %c0_i32_0 = arith.constant 0 : i32
    %c0_i32_1 = arith.constant 0 : i32
    return %c0_i32, %c0_i32_0 : i32, i32
  }
  func.func @transform_12(%arg0: i32, %arg1: i32) -> (i32, i32) {
    %c0_i32 = arith.constant 0 : i32
    %c0_i32_0 = arith.constant 0 : i32
    %c0_i32_1 = arith.constant 0 : i32
    return %c0_i32, %c0_i32_0 : i32, i32
  }
  func.func @transform_13(%arg0: i32, %arg1: i32) -> (i32, i32) {
    %c0_i32 = arith.constant 0 : i32
    %c0_i32_0 = arith.constant 0 : i32
    %c0_i32_1 = arith.constant 0 : i32
    return %c0_i32, %c0_i32_0 : i32, i32
  }
  func.func @transform_14(%arg0: i32, %arg1: i32) -> (i32, i32) {
    %c0_i32 = arith.constant 0 : i32
    %c0_i32_0 = arith.constant 0 : i32
    %c0_i32_1 = arith.constant 0 : i32
    return %c0_i32, %c0_i32_0 : i32, i32
  }
  func.func @transform_15(%arg0: i32, %arg1: i32) -> (i32, i32) {
    %c0_i32 = arith.constant 0 : i32
    return %arg0, %arg1 : i32, i32
  }
}

module attributes {stable_mosaic.version = 11 : i64} {
  func.func @_fused_caption_kernel(%arg0: i32, %arg1: i32, %arg2: memref<8x128xf32, #tpu.memory_space<vmem>>, %arg3: memref<128x128xbf16, #tpu.memory_space<vmem>>, %arg4: memref<1x128xf32, #tpu.memory_space<vmem>>, %arg5: memref<128x128xbf16, #tpu.memory_space<vmem>>, %arg6: memref<1x128xf32, #tpu.memory_space<vmem>>, %arg7: memref<128x128xbf16, #tpu.memory_space<vmem>>, %arg8: memref<1x128xf32, #tpu.memory_space<vmem>>, %arg9: memref<128x128xbf16, #tpu.memory_space<vmem>>, %arg10: memref<1x128xf32, #tpu.memory_space<vmem>>, %arg11: memref<128x128xbf16, #tpu.memory_space<vmem>>, %arg12: memref<1x128xf32, #tpu.memory_space<vmem>>, %arg13: memref<128x128xbf16, #tpu.memory_space<vmem>>, %arg14: memref<1x128xf32, #tpu.memory_space<vmem>>, %arg15: memref<128x128xbf16, #tpu.memory_space<vmem>>, %arg16: memref<1x128xf32, #tpu.memory_space<vmem>>, %arg17: memref<8x128xf32, #tpu.memory_space<vmem>>, %arg18: memref<8x128xf32, #tpu.memory_space<vmem>>) attributes {dimension_semantics = [#tpu.dimension_semantics<parallel>, #tpu.dimension_semantics<arbitrary>], iteration_bounds = array<i64: 2, 1>, scalar_prefetch = 0 : i64, scratch_operands = 1 : i64, tpu.core_type = #tpu.core_type<tc>, window_params = [{transform_indices = @transform_0, window_bounds = array<i64: 8, 128>}, {pipeline_mode = #tpu.pipeline_mode<synchronous>, transform_indices = @transform_1, window_bounds = array<i64: 128, 128>}, {pipeline_mode = #tpu.pipeline_mode<synchronous>, transform_indices = @transform_2, window_bounds = array<i64: 1, 128>}, {pipeline_mode = #tpu.pipeline_mode<synchronous>, transform_indices = @transform_3, window_bounds = array<i64: 128, 128>}, {pipeline_mode = #tpu.pipeline_mode<synchronous>, transform_indices = @transform_4, window_bounds = array<i64: 1, 128>}, {pipeline_mode = #tpu.pipeline_mode<synchronous>, transform_indices = @transform_5, window_bounds = array<i64: 128, 128>}, {pipeline_mode = #tpu.pipeline_mode<synchronous>, transform_indices = @transform_6, window_bounds = array<i64: 1, 128>}, {pipeline_mode = #tpu.pipeline_mode<synchronous>, transform_indices = @transform_7, window_bounds = array<i64: 128, 128>}, {pipeline_mode = #tpu.pipeline_mode<synchronous>, transform_indices = @transform_8, window_bounds = array<i64: 1, 128>}, {pipeline_mode = #tpu.pipeline_mode<synchronous>, transform_indices = @transform_9, window_bounds = array<i64: 128, 128>}, {pipeline_mode = #tpu.pipeline_mode<synchronous>, transform_indices = @transform_10, window_bounds = array<i64: 1, 128>}, {pipeline_mode = #tpu.pipeline_mode<synchronous>, transform_indices = @transform_11, window_bounds = array<i64: 128, 128>}, {pipeline_mode = #tpu.pipeline_mode<synchronous>, transform_indices = @transform_12, window_bounds = array<i64: 1, 128>}, {pipeline_mode = #tpu.pipeline_mode<synchronous>, transform_indices = @transform_13, window_bounds = array<i64: 128, 128>}, {pipeline_mode = #tpu.pipeline_mode<synchronous>, transform_indices = @transform_14, window_bounds = array<i64: 1, 128>}, {transform_indices = @transform_15, window_bounds = array<i64: 8, 128>}]} {
    %c0_i32 = arith.constant 0 : i32
    %0 = arith.cmpi eq, %arg1, %c0_i32 : i32
    %1 = arith.extui %0 : i1 to i32
    %c0_i32_0 = arith.constant 0 : i32
    %2 = arith.cmpi ne, %1, %c0_i32_0 : i32
    scf.if %2 {
      %c0_8 = arith.constant 0 : index
      %c0_9 = arith.constant 0 : index
      %11 = vector.load %arg2[%c0_8, %c0_9] : memref<8x128xf32, #tpu.memory_space<vmem>>, vector<8x128xf32>
      %12 = arith.truncf %11 : vector<8x128xf32> to vector<8x128xbf16>
      %c0_10 = arith.constant 0 : index
      %c0_11 = arith.constant 0 : index
      %13 = vector.load %arg3[%c0_10, %c0_11] : memref<128x128xbf16, #tpu.memory_space<vmem>>, vector<128x128xbf16>
      %cst_12 = arith.constant dense<0.000000e+00> : vector<8x128xf32>
      %14 = tpu.matmul %12, %13, %cst_12 {dimension_numbers = #tpu.dot_dimension_numbers<[1], [0], [0], [1], [0, 0, 1, 1], [], []>} : vector<8x128xbf16>, vector<128x128xbf16>, vector<8x128xf32> -> vector<8x128xf32>
      %c0_13 = arith.constant 0 : index
      %c0_14 = arith.constant 0 : index
      %15 = vector.load %arg4[%c0_13, %c0_14] : memref<1x128xf32, #tpu.memory_space<vmem>>, vector<1x128xf32>
      %16 = vector.broadcast %15 : vector<1x128xf32> to vector<8x128xf32>
      %17 = arith.addf %14, %16 : vector<8x128xf32>
      %18 = arith.truncf %17 : vector<8x128xf32> to vector<8x128xbf16>
      %c0_15 = arith.constant 0 : index
      %c0_16 = arith.constant 0 : index
      %19 = vector.load %arg5[%c0_15, %c0_16] : memref<128x128xbf16, #tpu.memory_space<vmem>>, vector<128x128xbf16>
      %cst_17 = arith.constant dense<0.000000e+00> : vector<8x128xf32>
      %20 = tpu.matmul %18, %19, %cst_17 {dimension_numbers = #tpu.dot_dimension_numbers<[1], [0], [0], [1], [0, 0, 1, 1], [], []>} : vector<8x128xbf16>, vector<128x128xbf16>, vector<8x128xf32> -> vector<8x128xf32>
      %c0_18 = arith.constant 0 : index
      %c0_19 = arith.constant 0 : index
      %21 = vector.load %arg6[%c0_18, %c0_19] : memref<1x128xf32, #tpu.memory_space<vmem>>, vector<1x128xf32>
      %22 = vector.broadcast %21 : vector<1x128xf32> to vector<8x128xf32>
      %23 = arith.addf %20, %22 : vector<8x128xf32>
      %cst_20 = arith.constant 0.000000e+00 : f32
      %24 = vector.broadcast %cst_20 : f32 to vector<8x128xf32>
      %25 = arith.maximumf %23, %24 : vector<8x128xf32>
      %26 = arith.truncf %25 : vector<8x128xf32> to vector<8x128xbf16>
      %c0_21 = arith.constant 0 : index
      %c0_22 = arith.constant 0 : index
      %27 = vector.load %arg7[%c0_21, %c0_22] : memref<128x128xbf16, #tpu.memory_space<vmem>>, vector<128x128xbf16>
      %cst_23 = arith.constant dense<0.000000e+00> : vector<8x128xf32>
      %28 = tpu.matmul %26, %27, %cst_23 {dimension_numbers = #tpu.dot_dimension_numbers<[1], [0], [0], [1], [0, 0, 1, 1], [], []>} : vector<8x128xbf16>, vector<128x128xbf16>, vector<8x128xf32> -> vector<8x128xf32>
      %c0_24 = arith.constant 0 : index
      %c0_25 = arith.constant 0 : index
      %29 = vector.load %arg8[%c0_24, %c0_25] : memref<1x128xf32, #tpu.memory_space<vmem>>, vector<1x128xf32>
      %30 = vector.broadcast %29 : vector<1x128xf32> to vector<8x128xf32>
      %31 = arith.addf %28, %30 : vector<8x128xf32>
      %cst_26 = arith.constant 0.000000e+00 : f32
      %32 = vector.broadcast %cst_26 : f32 to vector<8x128xf32>
      %33 = arith.maximumf %31, %32 : vector<8x128xf32>
      %34 = arith.truncf %33 : vector<8x128xf32> to vector<8x128xbf16>
      %c0_27 = arith.constant 0 : index
      %c0_28 = arith.constant 0 : index
      %35 = vector.load %arg9[%c0_27, %c0_28] : memref<128x128xbf16, #tpu.memory_space<vmem>>, vector<128x128xbf16>
      %cst_29 = arith.constant dense<0.000000e+00> : vector<8x128xf32>
      %36 = tpu.matmul %34, %35, %cst_29 {dimension_numbers = #tpu.dot_dimension_numbers<[1], [0], [0], [1], [0, 0, 1, 1], [], []>} : vector<8x128xbf16>, vector<128x128xbf16>, vector<8x128xf32> -> vector<8x128xf32>
      %c0_30 = arith.constant 0 : index
      %c0_31 = arith.constant 0 : index
      %37 = vector.load %arg10[%c0_30, %c0_31] : memref<1x128xf32, #tpu.memory_space<vmem>>, vector<1x128xf32>
      %38 = vector.broadcast %37 : vector<1x128xf32> to vector<8x128xf32>
      %39 = arith.addf %36, %38 : vector<8x128xf32>
      %cst_32 = arith.constant 0.000000e+00 : f32
      %40 = vector.broadcast %cst_32 : f32 to vector<8x128xf32>
      %41 = arith.maximumf %39, %40 : vector<8x128xf32>
      %42 = arith.truncf %41 : vector<8x128xf32> to vector<8x128xbf16>
      %c0_33 = arith.constant 0 : index
      %c0_34 = arith.constant 0 : index
      %43 = vector.load %arg11[%c0_33, %c0_34] : memref<128x128xbf16, #tpu.memory_space<vmem>>, vector<128x128xbf16>
      %cst_35 = arith.constant dense<0.000000e+00> : vector<8x128xf32>
      %44 = tpu.matmul %42, %43, %cst_35 {dimension_numbers = #tpu.dot_dimension_numbers<[1], [0], [0], [1], [0, 0, 1, 1], [], []>} : vector<8x128xbf16>, vector<128x128xbf16>, vector<8x128xf32> -> vector<8x128xf32>
      %c0_36 = arith.constant 0 : index
      %c0_37 = arith.constant 0 : index
      %45 = vector.load %arg12[%c0_36, %c0_37] : memref<1x128xf32, #tpu.memory_space<vmem>>, vector<1x128xf32>
      %46 = vector.broadcast %45 : vector<1x128xf32> to vector<8x128xf32>
      %47 = arith.addf %44, %46 : vector<8x128xf32>
      %cst_38 = arith.constant 0.000000e+00 : f32
      %48 = vector.broadcast %cst_38 : f32 to vector<8x128xf32>
      %49 = arith.maximumf %47, %48 : vector<8x128xf32>
      %50 = arith.truncf %49 : vector<8x128xf32> to vector<8x128xbf16>
      %c0_39 = arith.constant 0 : index
      %c0_40 = arith.constant 0 : index
      %51 = vector.load %arg13[%c0_39, %c0_40] : memref<128x128xbf16, #tpu.memory_space<vmem>>, vector<128x128xbf16>
      %cst_41 = arith.constant dense<0.000000e+00> : vector<8x128xf32>
      %52 = tpu.matmul %50, %51, %cst_41 {dimension_numbers = #tpu.dot_dimension_numbers<[1], [0], [0], [1], [0, 0, 1, 1], [], []>} : vector<8x128xbf16>, vector<128x128xbf16>, vector<8x128xf32> -> vector<8x128xf32>
      %c0_42 = arith.constant 0 : index
      %c0_43 = arith.constant 0 : index
      %53 = vector.load %arg14[%c0_42, %c0_43] : memref<1x128xf32, #tpu.memory_space<vmem>>, vector<1x128xf32>
      %54 = vector.broadcast %53 : vector<1x128xf32> to vector<8x128xf32>
      %55 = arith.addf %52, %54 : vector<8x128xf32>
      %cst_44 = arith.constant 0.000000e+00 : f32
      %56 = vector.broadcast %cst_44 : f32 to vector<8x128xf32>
      %57 = arith.maximumf %55, %56 : vector<8x128xf32>
      %c0_45 = arith.constant 0 : index
      %c0_46 = arith.constant 0 : index
      %58 = vector.load %arg18[%c0_45, %c0_46] : memref<8x128xf32, #tpu.memory_space<vmem>>, vector<8x128xf32>
      tpu.vector_store %arg18[%c0_45, %c0_46], %57 {strides = array<i32>} : memref<8x128xf32, #tpu.memory_space<vmem>>, vector<8x128xf32>,
    } else {
    }
    %c0 = arith.constant 0 : index
    %c0_1 = arith.constant 0 : index
    %3 = vector.load %arg18[%c0, %c0_1] : memref<8x128xf32, #tpu.memory_space<vmem>>, vector<8x128xf32>
    %4 = arith.truncf %3 : vector<8x128xf32> to vector<8x128xbf16>
    %c0_2 = arith.constant 0 : index
    %c0_3 = arith.constant 0 : index
    %5 = vector.load %arg15[%c0_2, %c0_3] : memref<128x128xbf16, #tpu.memory_space<vmem>>, vector<128x128xbf16>
    %cst = arith.constant dense<0.000000e+00> : vector<8x128xf32>
    %6 = tpu.matmul %4, %5, %cst {dimension_numbers = #tpu.dot_dimension_numbers<[1], [0], [0], [1], [0, 0, 1, 1], [], []>} : vector<8x128xbf16>, vector<128x128xbf16>, vector<8x128xf32> -> vector<8x128xf32>
    %c0_4 = arith.constant 0 : index
    %c0_5 = arith.constant 0 : index
    %7 = vector.load %arg16[%c0_4, %c0_5] : memref<1x128xf32, #tpu.memory_space<vmem>>, vector<1x128xf32>
    %8 = vector.broadcast %7 : vector<1x128xf32> to vector<8x128xf32>
    %9 = arith.addf %6, %8 : vector<8x128xf32>
    %c0_6 = arith.constant 0 : index
    %c0_7 = arith.constant 0 : index
    %10 = vector.load %arg17[%c0_6, %c0_7] : memref<8x128xf32, #tpu.memory_space<vmem>>, vector<8x128xf32>
    tpu.vector_store %arg17[%c0_6, %c0_7], %9 {strides = array<i32>} : memref<8x128xf32, #tpu.memory_space<vmem>>, vector<8x128xf32>,
    return
  }
  func.func @transform_0(%arg0: i32, %arg1: i32) -> (i32, i32) {
    %c0_i32 = arith.constant 0 : i32
    %c0_i32_0 = arith.constant 0 : i32
    return %arg0, %c0_i32 : i32, i32
  }
  func.func @transform_1(%arg0: i32, %arg1: i32) -> (i32, i32) {
    %c0_i32 = arith.constant 0 : i32
    %c0_i32_0 = arith.constant 0 : i32
    %c0_i32_1 = arith.constant 0 : i32
    return %c0_i32, %c0_i32_0 : i32, i32
  }
  func.func @transform_2(%arg0: i32, %arg1: i32) -> (i32, i32) {
    %c0_i32 = arith.constant 0 : i32
    %c0_i32_0 = arith.constant 0 : i32
    %c0_i32_1 = arith.constant 0 : i32
    return %c0_i32, %c0_i32_0 : i32, i32
  }
  func.func @transform_3(%arg0: i32, %arg1: i32) -> (i32, i32) {
    %c0_i32 = arith.constant 0 : i32
    %c0_i32_0 = arith.constant 0 : i32
    %c0_i32_1 = arith.constant 0 : i32
    return %c0_i32, %c0_i32_0 : i32, i32
  }
  func.func @transform_4(%arg0: i32, %arg1: i32) -> (i32, i32) {
    %c0_i32 = arith.constant 0 : i32
    %c0_i32_0 = arith.constant 0 : i32
    %c0_i32_1 = arith.constant 0 : i32
    return %c0_i32, %c0_i32_0 : i32, i32
  }
  func.func @transform_5(%arg0: i32, %arg1: i32) -> (i32, i32) {
    %c0_i32 = arith.constant 0 : i32
    %c0_i32_0 = arith.constant 0 : i32
    %c0_i32_1 = arith.constant 0 : i32
    return %c0_i32, %c0_i32_0 : i32, i32
  }
  func.func @transform_6(%arg0: i32, %arg1: i32) -> (i32, i32) {
    %c0_i32 = arith.constant 0 : i32
    %c0_i32_0 = arith.constant 0 : i32
    %c0_i32_1 = arith.constant 0 : i32
    return %c0_i32, %c0_i32_0 : i32, i32
  }
  func.func @transform_7(%arg0: i32, %arg1: i32) -> (i32, i32) {
    %c0_i32 = arith.constant 0 : i32
    %c0_i32_0 = arith.constant 0 : i32
    %c0_i32_1 = arith.constant 0 : i32
    return %c0_i32, %c0_i32_0 : i32, i32
  }
  func.func @transform_8(%arg0: i32, %arg1: i32) -> (i32, i32) {
    %c0_i32 = arith.constant 0 : i32
    %c0_i32_0 = arith.constant 0 : i32
    %c0_i32_1 = arith.constant 0 : i32
    return %c0_i32, %c0_i32_0 : i32, i32
  }
  func.func @transform_9(%arg0: i32, %arg1: i32) -> (i32, i32) {
    %c0_i32 = arith.constant 0 : i32
    %c0_i32_0 = arith.constant 0 : i32
    %c0_i32_1 = arith.constant 0 : i32
    return %c0_i32, %c0_i32_0 : i32, i32
  }
  func.func @transform_10(%arg0: i32, %arg1: i32) -> (i32, i32) {
    %c0_i32 = arith.constant 0 : i32
    %c0_i32_0 = arith.constant 0 : i32
    %c0_i32_1 = arith.constant 0 : i32
    return %c0_i32, %c0_i32_0 : i32, i32
  }
  func.func @transform_11(%arg0: i32, %arg1: i32) -> (i32, i32) {
    %c0_i32 = arith.constant 0 : i32
    %c0_i32_0 = arith.constant 0 : i32
    %c0_i32_1 = arith.constant 0 : i32
    return %c0_i32, %c0_i32_0 : i32, i32
  }
  func.func @transform_12(%arg0: i32, %arg1: i32) -> (i32, i32) {
    %c0_i32 = arith.constant 0 : i32
    %c0_i32_0 = arith.constant 0 : i32
    %c0_i32_1 = arith.constant 0 : i32
    return %c0_i32, %c0_i32_0 : i32, i32
  }
  func.func @transform_13(%arg0: i32, %arg1: i32) -> (i32, i32) {
    %c0_i32 = arith.constant 0 : i32
    %c0_i32_0 = arith.constant 0 : i32
    %c0_i32_1 = arith.constant 0 : i32
    return %c0_i32, %c0_i32_0 : i32, i32
  }
  func.func @transform_14(%arg0: i32, %arg1: i32) -> (i32, i32) {
    %c0_i32 = arith.constant 0 : i32
    %c0_i32_0 = arith.constant 0 : i32
    %c0_i32_1 = arith.constant 0 : i32
    return %c0_i32, %c0_i32_0 : i32, i32
  }
  func.func @transform_15(%arg0: i32, %arg1: i32) -> (i32, i32) {
    %c0_i32 = arith.constant 0 : i32
    return %arg0, %arg1 : i32, i32
  }
}

</mosaic_0001>

<bundles_post_ra>
// kernel: tpu_custom_call.1
= control target key start
LH: loop header
LB: loop body
LE: loop exit
PB: predicated region body
PF: predicated region fallthrough
CT: control target
= control target key end

     0   :  { %s2966_s0 = inlined_call_operand.hbm [shape: f32[16,128], index: 0, kind: input, shape index: {}]   ;;  %s2967_s1 = inlined_call_operand.hbm [shape: bf16[128,128], index: 1, kind: input, shape index: {}]   ;;  %s2968_s2 = inlined_call_operand.vmem [shape: f32[1,128], index: 2, kind: input, shape index: {}]   ;;  %s2969_s3 = inlined_call_operand.hbm [shape: bf16[128,128], index: 3, kind: input, shape index: {}]   ;;  %s2970_s4 = inlined_call_operand.vmem [shape: f32[1,128], index: 4, kind: input, shape index: {}]   ;;  %s2971_s5 = inlined_call_operand.hbm [shape: bf16[128,128], index: 5, kind: input, shape index: {}]   ;;  %s2972_s6 = inlined_call_operand.vmem [shape: f32[1,128], index: 6, kind: input, shape index: {}]   ;;  %s2973_s7 = inlined_call_operand.hbm [shape: bf16[128,128], index: 7, kind: input, shape index: {}]   ;;  %s2974_s8 = inlined_call_operand.vmem [shape: f32[1,128], index: 8, kind: input, shape index: {}]   ;;  %s2975_s9 = inlined_call_operand.hbm [shape: bf16[128,128], index: 9, kind: input, shape index: {}]   ;;  %s2976_s10 = inlined_call_operand.vmem [shape: f32[1,128], index: 10, kind: input, shape index: {}]   ;;  %s2977_s11 = inlined_call_operand.hbm [shape: bf16[128,128], index: 11, kind: input, shape index: {}]   ;;  %s2978_s12 = inlined_call_operand.vmem [shape: f32[1,128], index: 12, kind: input, shape index: {}]   ;;  %s2979_s13 = inlined_call_operand.hbm [shape: bf16[128,128], index: 13, kind: input, shape index: {}]   ;;  %s2980_s14 = inlined_call_operand.vmem [shape: f32[1,128], index: 14, kind: input, shape index: {}]   ;;  %s2981_s15 = inlined_call_operand.hbm [shape: f32[16,128], index: 15, kind: output, shape index: {}]  }
   0x1   :  { %2988 = sst [smem:[#allocation25_spill]] %s2967_s1 }
   0x2   :  { %2989 = sst [smem:[#allocation26_spill]] %s2968_s2 }
   0x3   :  { %2990 = sst [smem:[#allocation27_spill]] %s2970_s4 }
   0x4   :  { %2991 = sst [smem:[#allocation28_spill]] %s2972_s6 }
   0x5   :  { %2992 = sst [smem:[#allocation29_spill]] %s2974_s8 }
   0x6   :  { %2993 = sst [smem:[#allocation30_spill]] %s2976_s10 }
   0x7   :  { %2994 = sst [smem:[#allocation31_spill]] %s2978_s12 }
   0x8   :  { %2995 = sst [smem:[#allocation32_spill]] %s2980_s14 }
   0x9   :  { %2996 = sst [smem:[#allocation33_spill]] %s2981_s15 }
   0xa   :  { %20 = vsyncpa [#allocation4], 0 }
   0xb   :  { %22 = vsyncpa [#allocation4 + $0x1], 0 }
   0xc   :  { %23 = vsyncpa [#allocation7], 0 }
   0xd   :  { %24 = vsyncpa [#allocation10], 0 }
   0xe   :  { %25 = vsyncpa [#allocation13], 0 }
   0xf   :  { %26 = vsyncpa [#allocation16], 0 }
  0x10   :  { %27 = vsyncpa [#allocation5], 0 }
  0x11   :  { %29 = vsyncpa [#allocation5 + $0x1], 0  ;;  %s2490_s18 = smov 0   ;;  %s2492_s19 = smov 0  }
  0x12   :  { %s2494_s20 = smov 0   ;;  %s2496_s21 = smov 0  }
  0x13   :  { %s2498_s22 = smov 0   ;;  %s2500_s23 = smov 0  }
  0x14 LB: > { %2997 = sst [smem:[#allocation24_spill]] %s2387_s21  ;;  %s2982_s24 = sadd.s32 4294967295, %s2395_s23   ;;  %s2395_s23 = sphi %s2500_s23, %s35_s23   ;;  %s2391_s22 = sphi %s2498_s22, %s3028_s22   ;;  %s2387_s21 = sphi %s2496_s21, %s3027_s21   ;;  %s2383_s20 = sphi %s2494_s20, %s3026_s20   ;;  %s2379_s19 = sphi %s2492_s19, %s3025_s19   ;;  %s2375_s18 = sphi %s2490_s18, %s3024_s18  }
  0x15   : > { %p1587_p0 = scmp.ge.s32.totalorder %s2395_s23, 1  ;;  %p2524_p1 = scmp.eq.s32.totalorder %s2982_s24, 0 }
  0x16   : > { %p400_p2 = scmp.lt.s32.totalorder %s2395_s23, 3  ;;  %s2397_s27 = smov [#allocation6]  }
  0x17   : > { %s2998_s25 = scalar_select %p2524_p1, 1, 0 }
  0x18   : > { %p2529_p3 = pnand %p1587_p0, %p400_p2  ;;  %s412_s28 = sshll.u32 %s2397_s27, 4  ;;  %s2533_s28 = int_to_ptr.vmem [resolvable:$true] %s412_s28 }
  0x19   : > { %s2398_s30 = smov [#allocation9]   ;;  %s2399_s17 = smov [#allocation12]  }
  0x1a   : > { %s2999_s26 = scalar_select %p2529_p3, 1, 0 }
  0x1b   : > { %p1910_p4 = pneg %p2529_p3  ;;  %s444_s16 = sshll.u32 %s2398_s30, 4  ;;  %s2544_s16 = int_to_ptr.vmem [resolvable:$true] %s444_s16 }
  0x1c   : > { %s2546_s24 = sshll.u32 %s2399_s17, 4  ;;  %s3001_s1 = sld [smem:[#allocation25_spill]]  ;;  %s477_s24 = int_to_ptr.vmem [resolvable:$true] %s2546_s24 }
  0x1d   : > { %p2540_p6 = pnand %p1910_p4, %p2524_p1 }
  0x1f   : > { %p2556_p8 = pneg %p2540_p6 }
  0x22   : > { %s2071_s14 = scalar_lea.hbm %s3001_s1, 1024 }
  0x23   : > { %p2072_p7 = scmp.ne.s32.totalorder %s3001_s1, %s2071_s14  ;;  %p2078_p11 = scmp.lt.u32.totalorder %s2071_s14, %s3001_s1 }
  0x25   : > { %p2074_p9 = pnand %p2556_p8, %p2072_p7 }
  0x27   : > { %p2075_p10 = pneg %p2074_p9 }
  0x29   : > { %p2080_p12 = pnand %p2078_p11, %p2075_p10 }
  0x2b   : > { %2083 = shalt.err (!%p2080_p12)
}
  0x2c   : > { %s2084_s12 = scalar_lea.vmem %s2533_s28, 1024  ;;  %p2092_p4 = scmp.lt.s32.totalorder %s2533_s28, %s2533_s28 }
  0x2d   : > { %p2085_p13 = scmp.ne.s32.totalorder %s2533_s28, %s2084_s12  ;;  %p2093_p5 = scmp.lt.s32.totalorder %s2084_s12, %s2084_s12 }
  0x2f   : > { %p2087_p0 = pnand %p2085_p13, %p2556_p8  ;;  %p2094_p7 = por %p2093_p5, %p2092_p4 }
  0x31   : > { %p2088_p2 = pneg %p2087_p0 }
  0x33   : > { %p2095_p9 = pnand %p2094_p7, %p2088_p2 }
  0x35   : > { %2098 = shalt.err (!%p2095_p9)
}
  0x36   : > { %s2400_s15 = smov 64   ;;  %s2401_s14 = smov 4  }
  0x37   : > { %1913 = dma.hbm_to_vmem [thread:$0]  (!%p2540_p6), %s3001_s1, 1024, %s2533_s28, [#allocation7], %s2400_s15, %s2400_s15, %s2401_s14  }
  0x38   : > { %s2099_s12 = scalar_lea.hbm %s2971_s5, 1024 }
  0x39   : > { %p2100_p5 = scmp.ne.s32.totalorder %s2971_s5, %s2099_s12  ;;  %p2106_p12 = scmp.lt.u32.totalorder %s2099_s12, %s2971_s5 }
  0x3b   : > { %p2102_p10 = pnand %p2100_p5, %p2556_p8 }
  0x3d   : > { %p2103_p11 = pneg %p2102_p10 }
  0x3f   : > { %p2108_p13 = pnand %p2106_p12, %p2103_p11 }
  0x41   : > { %2111 = shalt.err (!%p2108_p13)
}
  0x42   : > { %s2112_s28 = scalar_lea.vmem %s2544_s16, 1024  ;;  %p2120_p7 = scmp.lt.s32.totalorder %s2544_s16, %s2544_s16 }
  0x43   : > { %p2113_p0 = scmp.ne.s32.totalorder %s2544_s16, %s2112_s28  ;;  %p2121_p9 = scmp.lt.s32.totalorder %s2112_s28, %s2112_s28 }
  0x45   : > { %p2115_p2 = pnand %p2113_p0, %p2556_p8  ;;  %p2122_p5 = por %p2121_p9, %p2120_p7 }
  0x47   : > { %p2116_p4 = pneg %p2115_p2 }
  0x49   : > { %p2123_p10 = pnand %p2122_p5, %p2116_p4 }
  0x4b   : > { %2126 = shalt.err (!%p2123_p10)
}
  0x4c   : > { %1919 = dma.hbm_to_vmem [thread:$0]  (!%p2540_p6), %s2971_s5, 1024, %s2544_s16, [#allocation10], %s2400_s15, %s2400_s15, %s2401_s14  }
  0x4d   : > { %s2127_s21 = scalar_lea.hbm %s2975_s9, 1024 }
  0x4e   : > { %p2128_p11 = scmp.ne.s32.totalorder %s2975_s9, %s2127_s21  ;;  %p2134_p0 = scmp.lt.u32.totalorder %s2127_s21, %s2975_s9 }
  0x50   : > { %p2130_p12 = pnand %p2128_p11, %p2556_p8 }
  0x52   : > { %p2131_p13 = pneg %p2130_p12 }
  0x54   : > { %p2136_p2 = pnand %p2134_p0, %p2131_p13 }
  0x56   : > { %2139 = shalt.err (!%p2136_p2)
}
  0x57   : > { %s2140_s28 = scalar_lea.vmem %s477_s24, 1024  ;;  %p2148_p5 = scmp.lt.s32.totalorder %s477_s24, %s477_s24 }
  0x58   : > { %p2141_p4 = scmp.ne.s32.totalorder %s477_s24, %s2140_s28  ;;  %p2149_p10 = scmp.lt.s32.totalorder %s2140_s28, %s2140_s28 }
  0x5a   : > { %p2143_p7 = pnand %p2141_p4, %p2556_p8  ;;  %p2150_p3 = por %p2149_p10, %p2148_p5 }
  0x5c   : > { %p2144_p9 = pneg %p2143_p7 }
  0x5e   : > { %p2151_p1 = pnand %p2150_p3, %p2144_p9 }
  0x60   : > { %2154 = shalt.err (!%p2151_p1)
}
  0x61   : > { %1925 = dma.hbm_to_vmem [thread:$0]  (!%p2540_p6), %s2975_s9, 1024, %s477_s24, [#allocation13], %s2400_s15, %s2400_s15, %s2401_s14  }
  0x62   : > { %s2402_s4 = smov [#allocation8]   ;;  %s2403_s8 = smov [#allocation11]  }
  0x63   : > { %s428_s6 = sshll.u32 %s2402_s4, 4  ;;  %s460_s21 = sshll.u32 %s2403_s8, 4  ;;  %s429_s6 = int_to_ptr.vmem [resolvable:$true] %s428_s6  ;;  %s461_s21 = int_to_ptr.vmem [resolvable:$true] %s460_s21 }
  0x64   : > { %s2155_s17 = scalar_lea.hbm %s2969_s3, 1024 }
  0x65   : > { %p2156_p1 = scmp.ne.s32.totalorder %s2969_s3, %s2155_s17  ;;  %p2162_p12 = scmp.lt.u32.totalorder %s2155_s17, %s2969_s3 }
  0x67   : > { %p2158_p3 = pnand %p2156_p1, %p2556_p8 }
  0x69   : > { %p2159_p11 = pneg %p2158_p3 }
  0x6b   : > { %p2164_p13 = pnand %p2162_p12, %p2159_p11 }
  0x6d   : > { %2167 = shalt.err (!%p2164_p13)
}
  0x6e   : > { %s2168_s24 = scalar_lea.vmem %s429_s6, 1024  ;;  %p2176_p7 = scmp.lt.s32.totalorder %s429_s6, %s429_s6 }
  0x6f   : > { %p2169_p0 = scmp.ne.s32.totalorder %s429_s6, %s2168_s24  ;;  %p2177_p9 = scmp.lt.s32.totalorder %s2168_s24, %s2168_s24 }
  0x71   : > { %p2171_p2 = pnand %p2169_p0, %p2556_p8  ;;  %p2178_p5 = por %p2177_p9, %p2176_p7 }
  0x73   : > { %p2172_p4 = pneg %p2171_p2 }
  0x75   : > { %p2179_p10 = pnand %p2178_p5, %p2172_p4 }
  0x77   : > { %2182 = shalt.err (!%p2179_p10)
}
  0x78   : > { %1916 = dma.hbm_to_vmem [thread:$0]  (!%p2540_p6), %s2969_s3, 1024, %s429_s6, [#allocation7], %s2400_s15, %s2400_s15, %s2401_s14  }
  0x79   : > { %s2183_s27 = scalar_lea.hbm %s2973_s7, 1024 }
  0x7a   : > { %p2184_p1 = scmp.ne.s32.totalorder %s2973_s7, %s2183_s27  ;;  %p2190_p12 = scmp.lt.u32.totalorder %s2183_s27, %s2973_s7 }
  0x7c   : > { %p2186_p3 = pnand %p2184_p1, %p2556_p8 }
  0x7e   : > { %p2187_p11 = pneg %p2186_p3 }
  0x80   : > { %p2192_p13 = pnand %p2190_p12, %p2187_p11 }
  0x82   : > { %2195 = shalt.err (!%p2192_p13)
}
  0x83   : > { %s2196_s16 = scalar_lea.vmem %s461_s21, 1024  ;;  %p2204_p7 = scmp.lt.s32.totalorder %s461_s21, %s461_s21 }
  0x84   : > { %p2197_p0 = scmp.ne.s32.totalorder %s461_s21, %s2196_s16  ;;  %p2205_p9 = scmp.lt.s32.totalorder %s2196_s16, %s2196_s16 }
  0x86   : > { %p2199_p2 = pnand %p2197_p0, %p2556_p8  ;;  %p2206_p5 = por %p2205_p9, %p2204_p7 }
  0x88   : > { %p2200_p4 = pneg %p2199_p2 }
  0x8a   : > { %p2207_p10 = pnand %p2206_p5, %p2200_p4 }
  0x8c   : > { %2210 = shalt.err (!%p2207_p10)
}
  0x8d   : > { %1922 = dma.hbm_to_vmem [thread:$0]  (!%p2540_p6), %s2973_s7, 1024, %s461_s21, [#allocation10], %s2400_s15, %s2400_s15, %s2401_s14  }
  0x8e   : > { %s2404_s1 = smov [#allocation14]   ;;  %s2405_s4 = smov [#allocation15]  }
  0x8f   : > { %s492_s2 = sshll.u32 %s2404_s1, 4  ;;  %s508_s8 = sshll.u32 %s2405_s4, 4  ;;  %s493_s2 = int_to_ptr.vmem [resolvable:$true] %s492_s2  ;;  %s509_s8 = int_to_ptr.vmem [resolvable:$true] %s508_s8 }
  0x90   : > { %s2211_s17 = scalar_lea.hbm %s2977_s11, 1024 }
  0x91   : > { %p2212_p1 = scmp.ne.s32.totalorder %s2977_s11, %s2211_s17  ;;  %p2218_p12 = scmp.lt.u32.totalorder %s2211_s17, %s2977_s11 }
  0x93   : > { %p2214_p3 = pnand %p2212_p1, %p2556_p8 }
  0x95   : > { %p2215_p11 = pneg %p2214_p3 }
  0x97   : > { %p2220_p13 = pnand %p2218_p12, %p2215_p11 }
  0x99   : > { %2223 = shalt.err (!%p2220_p13)
}
  0x9a   : > { %s2224_s21 = scalar_lea.vmem %s493_s2, 1024  ;;  %p2232_p7 = scmp.lt.s32.totalorder %s493_s2, %s493_s2 }
  0x9b   : > { %p2225_p0 = scmp.ne.s32.totalorder %s493_s2, %s2224_s21  ;;  %p2233_p9 = scmp.lt.s32.totalorder %s2224_s21, %s2224_s21 }
  0x9d   : > { %p2227_p2 = pnand %p2225_p0, %p2556_p8  ;;  %p2234_p5 = por %p2233_p9, %p2232_p7 }
  0x9f   : > { %p2228_p4 = pneg %p2227_p2 }
  0xa1   : > { %p2235_p10 = pnand %p2234_p5, %p2228_p4 }
  0xa3   : > { %2238 = shalt.err (!%p2235_p10)
}
  0xa4   : > { %1928 = dma.hbm_to_vmem [thread:$0]  (!%p2540_p6), %s2977_s11, 1024, %s493_s2, [#allocation13], %s2400_s15, %s2400_s15, %s2401_s14  }
  0xa5   : > { %s2239_s30 = scalar_lea.hbm %s2979_s13, 1024 }
  0xa6   : > { %p2240_p1 = scmp.ne.s32.totalorder %s2979_s13, %s2239_s30  ;;  %p2246_p12 = scmp.lt.u32.totalorder %s2239_s30, %s2979_s13 }
  0xa8   : > { %p2242_p3 = pnand %p2240_p1, %p2556_p8 }
  0xaa   : > { %p2243_p11 = pneg %p2242_p3 }
  0xac   : > { %p2248_p13 = pnand %p2246_p12, %p2243_p11 }
  0xae   : > { %2251 = shalt.err (!%p2248_p13)
}
  0xaf   : > { %s2252_s6 = scalar_lea.vmem %s509_s8, 1024  ;;  %p2260_p7 = scmp.lt.s32.totalorder %s509_s8, %s509_s8 }
  0xb0   : > { %p2253_p0 = scmp.ne.s32.totalorder %s509_s8, %s2252_s6  ;;  %p2261_p9 = scmp.lt.s32.totalorder %s2252_s6, %s2252_s6 }
  0xb2   : > { %p2255_p2 = pnand %p2253_p0, %p2556_p8  ;;  %p2262_p5 = por %p2261_p9, %p2260_p7 }
  0xb4   : > { %p2256_p4 = pneg %p2255_p2 }
  0xb6   : > { %p2263_p10 = pnand %p2262_p5, %p2256_p4 }
  0xb8   : > { %2266 = shalt.err (!%p2263_p10)
}
  0xb9   : > { %1931 = dma.hbm_to_vmem [thread:$0]  (!%p2540_p6), %s2979_s13, 1024, %s509_s8, [#allocation16], %s2400_s15, %s2400_s15, %s2401_s14  }
  0xba   : > { %s1586_s10 = sadd.s32 4294967294, %s2395_s23   ;;  %s47_s29 = sadd.s32 1, %s2391_s22 }
  0xbb   : > { %s54_s24 = sadd.s32 1, %s2383_s20  ;;  %p49_p8 = scmp.ge.s32.totalorder %s47_s29, 2 }
  0xbc   : > { %p61_p1 = scmp.ne.s32.totalorder %s2383_s20, %s2379_s19  ;;  %p62_p3 = scmp.eq.s32.totalorder %s2395_s23, 0 }
  0xbd   : > { %p67_p11 = scmp.ne.s32.totalorder %s2379_s19, %s2375_s18  ;;  %s3030_s29 = smov (%p49_p8, %s47_s29), 0 }
  0xbe   : > { %p2722_p12 = por %p62_p3, %p61_p1  ;;  %p3004_p13 = scmp.ne.s32.totalorder %s2998_s25, 0 }
  0xbf   : > { %s51_s14 = ssub.s32 %s2391_s22, %s3030_s29  ;;  %s3006_s8 = sadd.s32 4294967295, %s2395_s23  }
  0xc0   : > { %p2728_p6 = por %p3004_p13, %p67_p11  ;;  %p387_p0 = scmp.eq.s32.totalorder %s3006_s8, 1 }
  0xc1   : > { %p52_p2 = scmp.eq.s32.totalorder %s51_s14, 0  ;;  %p393_p4 = scmp.eq.s32.totalorder %s1586_s10, 1 }
  0xc2   : > { %p2736_p7 = por %p387_p0, %p61_p1  ;;  %p1947_p9 = scmp.lt.s32.totalorder %s2395_s23, 2 }
  0xc3   : > { %s2742_s27 = scalar_select %p52_p2, %s2383_s20, %s54_s24  }
  0xc4   : > { %s3007_s4 = scalar_select %p2736_p7, 1, 0 }
  0xc5   : > { %p2744_p5 = por %p393_p4, %p67_p11  ;;  %s525_s17 = sand.u32 1, %s2383_s20  }
  0xc6   : > { %s1596_s12 = sshll.u32 %s525_s17, 3  ;;  %s1597_s28 = sshll.u32 %s2391_s22, 7 }
  0xc7   : > { %s3008_s30 = scalar_select %p2744_p5, 1, 0 }
  0xc8   : > { %s2753_s2 = scalar_lea.hbm %s2966_s0, %s1597_s28  ;;  %s529_s21 = scalar_lea.vmem [#allocation3], %s1596_s12 }
  0xc9   : > { %s536_s10 = sshll.u32 %s529_s21, 4  ;;  %p2759_p10 = pnand %p1947_p9, %p2722_p12  ;;  %s2755_s10 = int_to_ptr.vmem [resolvable:$true] %s536_s10 }
  0xca   : > { %s526_s14 = scalar_lea.sflag [#allocation4], %s525_s17  ;;  %s2267_s8 = scalar_lea.hbm %s2753_s2, 128 }
  0xcb   : > { %p2268_p8 = scmp.ne.s32.totalorder %s2753_s2, %s2267_s8  ;;  %p2269_p1 = pneg %p2759_p10 }
  0xcc   : > { %s2272_s16 = scalar_lea.hbm %s2966_s0, 256  ;;  %p2273_p12 = scmp.lt.u32.totalorder %s2753_s2, %s2966_s0 }
  0xcd   : > { %p2270_p3 = pnand %p2269_p1, %p2268_p8  ;;  %p2274_p13 = scmp.lt.u32.totalorder %s2272_s16, %s2267_s8 }
  0xce   : > { %p2276_p2 = scmp.lt.u32.totalorder %s2267_s8, %s2753_s2 }
  0xcf   : > { %p2271_p11 = pneg %p2270_p3  ;;  %p2275_p0 = por %p2274_p13, %p2273_p12 }
  0xd1   : > { %p2277_p4 = por %p2276_p2, %p2275_p0 }
  0xd3   : > { %p2278_p9 = pnand %p2277_p4, %p2271_p11 }
  0xd5   : > { %2281 = shalt.err (!%p2278_p9)
}
  0xd6   : > { %s2282_s17 = scalar_lea.vmem %s2755_s10, 128  ;;  %s2406_s21 = smov [#allocation3]  }
  0xd7   : > { %p2283_p8 = scmp.ne.s32.totalorder %s2755_s10, %s2282_s17  ;;  %s2287_s12 = sshll.u32 %s2406_s21, 4  ;;  %s2288_s12 = int_to_ptr.vmem [resolvable:$false] %s2287_s12 }
  0xd8   : > { %s2289_s28 = scalar_lea.vmem %s2288_s12, 256  ;;  %p2290_p7 = scmp.lt.s32.totalorder %s2755_s10, %s2288_s12 }
  0xd9   : > { %p2285_p3 = pnand %p2283_p8, %p2269_p1  ;;  %p2291_p12 = scmp.lt.s32.totalorder %s2289_s28, %s2282_s17 }
  0xdb   : > { %p2286_p5 = pneg %p2285_p3  ;;  %p2292_p13 = por %p2291_p12, %p2290_p7 }
  0xdd   : > { %p2293_p0 = pnand %p2292_p13, %p2286_p5 }
  0xdf   : > { %2296 = shalt.err (!%p2293_p0)
}
  0xe0   : > { %1935 = dma.hbm_to_vmem [thread:$0]  (!%p2759_p10), %s2753_s2, 128, %s2755_s10, %s526_s14  }
  0xe1   : > { %p3010_p11 = scmp.ne.s32.totalorder %s2999_s26, 0 }
  0xe2   : > { %s2791_s8 = sand.u32 (!%p3010_p11), 1, %s2379_s19  }
  0xe3   : > { %545 = sbr.rel (%p3010_p11) target bundleno = 1812 (0x714), region = 80  ;;  %s1599_s16 = sshll.u32 (!%p3010_p11), %s2791_s8, 3 }
  0xe4   : > { %s548_s1 = scalar_lea.sflag (!%p3010_p11), [#allocation4], %s2791_s8  ;;  %s2797_s6 = scalar_lea.vmem (!%p3010_p11), [#allocation3], %s1599_s16 }
  0xea   : > { %2350 = dma.done.wait (%p2728_p6), %s548_s1, 128  }
  0xeb   : > { %2352 = vsyncadd (%p2728_p6), %s548_s1, 4294967168  ;;  %p3011_p7 = scmp.ne.s32.totalorder %s2998_s25, 0 }
  0xed   : > { %2354 = dma.done.wait (%p3011_p7), [#allocation7], 2048  }
  0xee   : > { %2356 = vsyncadd (%p3011_p7), [#allocation7], 4294965248 }
  0xef   : > { %2358 = dma.done.wait (%p3011_p7), [#allocation10], 2048  }
  0xf0   : > { %2360 = vsyncadd (%p3011_p7), [#allocation10], 4294965248 }
  0xf1   : > { %2362 = dma.done.wait (%p3011_p7), [#allocation13], 2048  }
  0xf2   : > { %2364 = vsyncadd (%p3011_p7), [#allocation13], 4294965248 }
  0xf3   : > { %2366 = dma.done.wait (%p3011_p7), [#allocation16], 1024  }
  0xf4   : > { %2368 = vsyncadd (%p3011_p7), [#allocation16], 4294966272  ;;  %v2407_v0 = vmov 0.0   ;;  %vm2408_vm0 = vmmov 0   ;;  %v2015_v1 = vld [vmem:[#allocation6] sm:$0xff]   ;;  %v2016_v2 = vld [vmem:[#allocation6 + $0x8] sm:$0xff]  }
  0xf5   : > { %1738 = vmatprep.subr.bf16.mxu0 %v2407_v0  ;;  %1754 = vmatprep.mubr.msk.bf16.mxu0 %vm2408_vm0, %v2407_v0  ;;  %v2017_v3 = vld [vmem:[#allocation6 + $0x10] sm:$0xff]   ;;  %v2023_v4 = vld [vmem:[#allocation8] sm:$0xff]   ;;  %v2018_v5 = vld [vmem:[#allocation6 + $0x18] sm:$0xff]   ;;  %s3012_s15 = sld [smem:[#allocation26_spill]]  ;;  %s3013_s24 = sld [smem:[#allocation27_spill]] }
  0xf6   : > { %1758 = vmatprep.subr.bf16.mxu1 %v2407_v0  ;;  %1774 = vmatprep.mubr.msk.bf16.mxu1 %vm2408_vm0, %v2407_v0  ;;  %v2024_v6 = vld [vmem:[#allocation8 + $0x8] sm:$0xff]   ;;  %v2019_v7 = vld [vmem:[#allocation6 + $0x20] sm:$0xff]   ;;  %v2025_v8 = vld [vmem:[#allocation8 + $0x10] sm:$0xff]   ;;  %s3014_s21 = sld [smem:[#allocation28_spill]]  ;;  %s3015_s1 = sld [smem:[#allocation29_spill]] }
  0xf7   : > { %1739 = vmatpush3.bf16.msra.mxu0 %v2015_v1  ;;  %1759 = vmatpush3.bf16.msra.mxu1 %v2023_v4  ;;  %v2020_v9 = vld [vmem:[#allocation6 + $0x28] sm:$0xff]   ;;  %v2026_v10 = vld [vmem:[#allocation8 + $0x18] sm:$0xff]   ;;  %v2021_v11 = vld [vmem:[#allocation6 + $0x30] sm:$0xff]   ;;  %s3016_s26 = sld [smem:[#allocation30_spill]]  ;;  %s625_s28 = scalar_lea.vmem [#allocation17], %s1599_s16 }
  0xf8   : > { %1740 = vmatprep.subr.bf16.mxu0 %v2407_v0  ;;  %1760 = vmatprep.subr.bf16.mxu1 %v2407_v0  ;;  %v2027_v12 = vld [vmem:[#allocation8 + $0x20] sm:$0xff]   ;;  %v2022_v13 = vld [vmem:[#allocation6 + $0x38] sm:$0xff]   ;;  %v2028_v15 = vld [vmem:[#allocation8 + $0x28] sm:$0xff]   ;;  %p3021_p5 = scmp.ne.s32.totalorder %s3007_s4, 0  ;;  %s2409_s16 = smov [#allocation17]  }
  0xf9   : > { %v631_v14 = vld [vmem:[%s2797_s6] sm:$0xff]  ;;  %v2031_v19 = vld [vmem:[#allocation9] sm:$0xff]   ;;  %v2032_v20 = vld [vmem:[#allocation9 + $0x8] sm:$0xff]  }
  0xfa   : > { %v632_v16 = vpack.c.bf16 %v631_v14, %v631_v14  ;;  %v2029_v17 = vld [vmem:[#allocation8 + $0x30] sm:$0xff]   ;;  %v2030_v18 = vld [vmem:[#allocation8 + $0x38] sm:$0xff]   ;;  %v2035_v23 = vld [vmem:[#allocation9 + $0x20] sm:$0xff]  }
  0xfb   : > { %1741 = vmatpush3.bf16.msra.mxu0 %v2016_v2  ;;  %1761 = vmatpush3.bf16.msra.mxu1 %v2024_v6  ;;  %v2033_v21 = vld [vmem:[#allocation9 + $0x10] sm:$0xff]   ;;  %v2034_v22 = vld [vmem:[#allocation9 + $0x18] sm:$0xff]   ;;  %v2036_v24 = vld [vmem:[#allocation9 + $0x28] sm:$0xff]  }
  0xfc   : > { %1742 = vmatprep.subr.bf16.mxu0 %v2407_v0  ;;  %1762 = vmatprep.subr.bf16.mxu1 %v2407_v0  ;;  %v1608_v25 = vld [vmem:[%s3012_s15] ss:$0 sm:$0xff]  ;;  %v2038_v33 = vld [vmem:[#allocation9 + $0x38] sm:$0xff]   ;;  %v2039_v34 = vld [vmem:[#allocation11] sm:$0xff]   ;;  %s3017_s15 = sld [smem:[#allocation24_spill]] }
  0xfd   : > { %v2037_v32 = vld [vmem:[#allocation9 + $0x30] sm:$0xff]   ;;  %v2040_v35 = vld [vmem:[#allocation11 + $0x8] sm:$0xff]   ;;  %v2042_v37 = vld [vmem:[#allocation11 + $0x18] sm:$0xff]  }
  0xfe   : > { %v2041_v36 = vld [vmem:[#allocation11 + $0x10] sm:$0xff]   ;;  %v2043_v38 = vld [vmem:[#allocation11 + $0x20] sm:$0xff]   ;;  %v2044_v39 = vld [vmem:[#allocation11 + $0x28] sm:$0xff]  }
  0xff   : > { %1743 = vmatpush3.bf16.msra.mxu0 %v2017_v3  ;;  %1763 = vmatpush3.bf16.msra.mxu1 %v2025_v8  ;;  %v1617_v40 = vld [vmem:[%s3013_s24] ss:$0 sm:$0xff]  ;;  %v2046_v49 = vld [vmem:[#allocation11 + $0x38] sm:$0xff]   ;;  %v2047_v50 = vld [vmem:[#allocation12] sm:$0xff]   ;;  %s3018_s24 = sld [smem:[#allocation31_spill]] }
 0x100   : > { %1744 = vmatprep.subr.bf16.mxu0 %v2407_v0  ;;  %1764 = vmatprep.subr.bf16.mxu1 %v2407_v0  ;;  %v2045_v48 = vld [vmem:[#allocation11 + $0x30] sm:$0xff]   ;;  %v2048_v51 = vld [vmem:[#allocation12 + $0x8] sm:$0xff]   ;;  %v2050_v53 = vld [vmem:[#allocation12 + $0x18] sm:$0xff]  }
 0x101   : > { %v2049_v52 = vld [vmem:[#allocation12 + $0x10] sm:$0xff]   ;;  %v2051_v54 = vld [vmem:[#allocation12 + $0x20] sm:$0xff]   ;;  %v2052_v55 = vld [vmem:[#allocation12 + $0x28] sm:$0xff]  }
 0x102   : > { %v1626_v56 = vld [vmem:[%s3014_s21] ss:$0 sm:$0xff]  ;;  %v2054_v2 = vld [vmem:[#allocation12 + $0x38] sm:$0xff]   ;;  %v2055_v3 = vld [vmem:[#allocation14] sm:$0xff]   ;;  %s3019_s21 = sld [smem:[#allocation32_spill]]  ;;  %s1672_s12 = sshll.u32 %s3017_s15, 7 }
 0x103   : > { %1745 = vmatpush3.bf16.msra.mxu0 %v2018_v5  ;;  %1765 = vmatpush3.bf16.msra.mxu1 %v2026_v10  ;;  %v2053_v1 = vld [vmem:[#allocation12 + $0x30] sm:$0xff]   ;;  %v2056_v4 = vld [vmem:[#allocation14 + $0x8] sm:$0xff]   ;;  %v2058_v6 = vld [vmem:[#allocation14 + $0x18] sm:$0xff]   ;;  %s1425_s15 = scalar_lea.sflag [#allocation5], %s2791_s8 }
 0x104   : > { %1746 = vmatprep.subr.bf16.mxu0 %v2407_v0  ;;  %1766 = vmatprep.subr.bf16.mxu1 %v2407_v0  ;;  %v2057_v5 = vld [vmem:[#allocation14 + $0x10] sm:$0xff]   ;;  %v2060_v8 = vld [vmem:[#allocation14 + $0x28] sm:$0xff]  }
 0x107   : > { %1747 = vmatpush3.bf16.msra.mxu0 %v2019_v7  ;;  %1767 = vmatpush3.bf16.msra.mxu1 %v2027_v12  ;;  %v2059_v7 = vld [vmem:[#allocation14 + $0x20] sm:$0xff]  }
 0x108   : > { %1748 = vmatprep.subr.bf16.mxu0 %v2407_v0  ;;  %1768 = vmatprep.subr.bf16.mxu1 %v2407_v0 }
 0x10b   : > { %1749 = vmatpush3.bf16.msra.mxu0 %v2020_v9  ;;  %1769 = vmatpush3.bf16.msra.mxu1 %v2028_v15  ;;  %v1635_v9 = vld [vmem:[%s3015_s1] ss:$0 sm:$0xff]  ;;  %s1439_s1 = sshll.u32 %s625_s28, 4  ;;  %s2919_s1 = int_to_ptr.vmem [resolvable:$true] %s1439_s1 }
 0x10c   : > { %1750 = vmatprep.subr.bf16.mxu0 %v2407_v0  ;;  %1770 = vmatprep.subr.bf16.mxu1 %v2407_v0  ;;  %s2297_s10 = scalar_lea.vmem %s2919_s1, 128 }
 0x10d   : > { %p2298_p6 = scmp.ne.s32.totalorder %s2919_s1, %s2297_s10 }
 0x10f   : > { %1751 = vmatpush3.bf16.msra.mxu0 %v2021_v11  ;;  %1771 = vmatpush3.bf16.msra.mxu1 %v2029_v17  ;;  %v2061_v17 = vld [vmem:[#allocation14 + $0x30] sm:$0xff]   ;;  %p2299_p10 = pnand %p2298_p6, %p3021_p5 }
 0x110   : > { %1752 = vmatprep.subr.bf16.mxu0 %v2407_v0  ;;  %1772 = vmatprep.subr.bf16.mxu1 %v2407_v0 }
 0x111   : > { %p2300_p1 = pneg %p2299_p10 }
 0x113   : > { %1753 = vmatpush3.bf16.msra.mxu0 %v2022_v13  ;;  %1773 = vmatpush3.bf16.msra.mxu1 %v2030_v18  ;;  %v2062_v18 = vld [vmem:[#allocation14 + $0x38] sm:$0xff]  }
 0x114   : > { %1778 = vmatprep.subr.bf16.mxu0 %v2407_v0  ;;  %1798 = vmatprep.subr.bf16.mxu1 %v2407_v0 }
 0x116   : > { %1755 = vmatmul.mubr.bf16.vlgmr.msra.gmra.mrb[0].mxu0 %v632_v16 }
 0x117   : > { %1794 = vmatprep.mubr.msk.bf16.mxu0 %vm2408_vm0, %v2407_v0  ;;  %1779 = vmatpush3.bf16.msra.mxu0 %v2031_v19  ;;  %v2063_v19 = vld [vmem:[#allocation15] sm:$0xff]  }
 0x118   : > { %1780 = vmatprep.subr.bf16.mxu0 %v2407_v0 }
 0x11b   : > { %1781 = vmatpush3.bf16.msra.mxu0 %v2032_v20  ;;  %v2064_v20 = vld [vmem:[#allocation15 + $0x8] sm:$0xff]  }
 0x11c   : > { %1782 = vmatprep.subr.bf16.mxu0 %v2407_v0 }
 0x11f   : > { %1783 = vmatpush3.bf16.msra.mxu0 %v2033_v21  ;;  %v2065_v21 = vld [vmem:[#allocation15 + $0x10] sm:$0xff]  }
 0x120   : > { %1784 = vmatprep.subr.bf16.mxu0 %v2407_v0 }
 0x123   : > { %1785 = vmatpush3.bf16.msra.mxu0 %v2034_v22  ;;  %v2066_v22 = vld [vmem:[#allocation15 + $0x18] sm:$0xff]  }
 0x124   : > { %1786 = vmatprep.subr.bf16.mxu0 %v2407_v0 }
 0x127   : > { %1787 = vmatpush3.bf16.msra.mxu0 %v2035_v23  ;;  %v2067_v23 = vld [vmem:[#allocation15 + $0x20] sm:$0xff]  }
 0x128   : > { %1788 = vmatprep.subr.bf16.mxu0 %v2407_v0 }
 0x12b   : > { %1789 = vmatpush3.bf16.msra.mxu0 %v2036_v24  ;;  %v2068_v24 = vld [vmem:[#allocation15 + $0x28] sm:$0xff]  }
 0x12c   : > { %1790 = vmatprep.subr.bf16.mxu0 %v2407_v0 }
 0x12f   : > { %1791 = vmatpush3.bf16.msra.mxu0 %v2037_v32 }
 0x130   : > { %1792 = vmatprep.subr.bf16.mxu0 %v2407_v0 }
 0x133   : > { %1793 = vmatpush3.bf16.msra.mxu0 %v2038_v33  ;;  %v2069_v33 = vld [vmem:[#allocation15 + $0x30] sm:$0xff]  }
 0x134   : > { %1818 = vmatprep.subr.bf16.mxu0 %v2407_v0 }
 0x1e9   : > { %v738_v26 = vpop.f32.mrb[0].mxu0 }
 0x1ea   : > { %v739_v27 = vadd.f32 %v1608_v25, %v738_v26  ;;  %v1756_v28 = vpop.f32.mrb[1].mxu0  ;;  %v1644_v25 = vld [vmem:[%s3016_s26] ss:$0 sm:$0xff]  ;;  %s3020_s26 = sld [smem:[#allocation33_spill]] }
 0x1eb   : > { %v741_v29 = vpop.f32.mrb[2].mxu0 }
 0x1ec   : > { %v744_v30 = vpack.c.bf16 %v739_v27, %v739_v27  ;;  %v1757_v31 = vpop.f32.mrb[3].mxu0 }
 0x1ee   : > { %1775 = vmatmul.mubr.bf16.vlgmr.msra.gmra.mrb[0].mxu1 %v744_v30 }
 0x1ef   : > { %1814 = vmatprep.mubr.msk.bf16.mxu1 %vm2408_vm0, %v2407_v0  ;;  %1799 = vmatpush3.bf16.msra.mxu1 %v2039_v34  ;;  %v2070_v34 = vld [vmem:[#allocation15 + $0x38] sm:$0xff]  }
 0x1f0   : > { %1800 = vmatprep.subr.bf16.mxu1 %v2407_v0  ;;  %s2917_s2 = scalar_lea.hbm %s3020_s26, %s1672_s12 }
 0x1f3   : > { %1801 = vmatpush3.bf16.msra.mxu1 %v2040_v35  ;;  %v1653_v35 = vld [vmem:[%s3018_s24] ss:$0 sm:$0xff]  ;;  %s2301_s24 = sshll.u32 %s2409_s16, 4  ;;  %s2302_s24 = int_to_ptr.vmem [resolvable:$false] %s2301_s24 }
 0x1f4   : > { %1802 = vmatprep.subr.bf16.mxu1 %v2407_v0  ;;  %s2303_s14 = scalar_lea.vmem %s2302_s24, 256  ;;  %p2304_p2 = scmp.lt.s32.totalorder %s2919_s1, %s2302_s24 }
 0x1f5   : > { %p2305_p4 = scmp.lt.s32.totalorder %s2303_s14, %s2297_s10 }
 0x1f7   : > { %1803 = vmatpush3.bf16.msra.mxu1 %v2041_v36  ;;  %p2306_p9 = por %p2305_p4, %p2304_p2 }
 0x1f8   : > { %1804 = vmatprep.subr.bf16.mxu1 %v2407_v0 }
 0x1f9   : > { %p2307_p8 = pnand %p2306_p9, %p2300_p1 }
 0x1fb   : > { %1805 = vmatpush3.bf16.msra.mxu1 %v2042_v37 }
 0x1fc   : > { %1806 = vmatprep.subr.bf16.mxu1 %v2407_v0 }
 0x1ff   : > { %1807 = vmatpush3.bf16.msra.mxu1 %v2043_v38 }
 0x200   : > { %1808 = vmatprep.subr.bf16.mxu1 %v2407_v0 }
 0x203   : > { %1809 = vmatpush3.bf16.msra.mxu1 %v2044_v39 }
 0x204   : > { %1810 = vmatprep.subr.bf16.mxu1 %v2407_v0 }
 0x207   : > { %1811 = vmatpush3.bf16.msra.mxu1 %v2045_v48 }
 0x208   : > { %1812 = vmatprep.subr.bf16.mxu1 %v2407_v0 }
 0x20b   : > { %1813 = vmatpush3.bf16.msra.mxu1 %v2046_v49 }
 0x20c   : > { %1838 = vmatprep.subr.bf16.mxu1 %v2407_v0 }
 0x2c1   : > { %v850_v41 = vpop.f32.mrb[0].mxu1 }
 0x2c2   : > { %v851_v42 = vadd.f32 %v1617_v40, %v850_v41  ;;  %v1776_v43 = vpop.f32.mrb[1].mxu1 }
 0x2c3   : > { %v853_v44 = vpop.f32.mrb[2].mxu1 }
 0x2c4   : > { %v856_v45 = vmax.f32 %v851_v42, 0.0  ;;  %v1777_v46 = vpop.f32.mrb[3].mxu1 }
 0x2c6   : > { %v857_v47 = vpack.c.bf16 %v856_v45, %v856_v45 }
 0x2c8   : > { %1795 = vmatmul.mubr.bf16.vlgmr.msra.gmra.mrb[4].mxu0 %v857_v47 }
 0x2c9   : > { %1834 = vmatprep.mubr.msk.bf16.mxu0 %vm2408_vm0, %v2407_v0  ;;  %1819 = vmatpush3.bf16.msra.mxu0 %v2047_v50 }
 0x2ca   : > { %1820 = vmatprep.subr.bf16.mxu0 %v2407_v0 }
 0x2cd   : > { %1821 = vmatpush3.bf16.msra.mxu0 %v2048_v51 }
 0x2ce   : > { %1822 = vmatprep.subr.bf16.mxu0 %v2407_v0 }
 0x2d1   : > { %1823 = vmatpush3.bf16.msra.mxu0 %v2049_v52 }
 0x2d2   : > { %1824 = vmatprep.subr.bf16.mxu0 %v2407_v0 }
 0x2d5   : > { %1825 = vmatpush3.bf16.msra.mxu0 %v2050_v53 }
 0x2d6   : > { %1826 = vmatprep.subr.bf16.mxu0 %v2407_v0 }
 0x2d9   : > { %1827 = vmatpush3.bf16.msra.mxu0 %v2051_v54 }
 0x2da   : > { %1828 = vmatprep.subr.bf16.mxu0 %v2407_v0 }
 0x2dd   : > { %1829 = vmatpush3.bf16.msra.mxu0 %v2052_v55 }
 0x2de   : > { %1830 = vmatprep.subr.bf16.mxu0 %v2407_v0 }
 0x2e1   : > { %1831 = vmatpush3.bf16.msra.mxu0 %v2053_v1 }
 0x2e2   : > { %1832 = vmatprep.subr.bf16.mxu0 %v2407_v0 }
 0x2e5   : > { %1833 = vmatpush3.bf16.msra.mxu0 %v2054_v2 }
 0x2e6   : > { %1858 = vmatprep.subr.bf16.mxu0 %v2407_v0 }
 0x39b   : > { %v963_v57 = vpop.f32.mrb[4].mxu0 }
 0x39c   : > { %v964_v58 = vadd.f32 %v1626_v56, %v963_v57  ;;  %v1796_v59 = vpop.f32.mrb[5].mxu0 }
 0x39d   : > { %v966_v60 = vpop.f32.mrb[6].mxu0 }
 0x39e   : > { %v969_v61 = vmax.f32 %v964_v58, 0.0  ;;  %v1797_v62 = vpop.f32.mrb[7].mxu0 }
 0x3a0   : > { %v970_v63 = vpack.c.bf16 %v969_v61, %v969_v61 }
 0x3a2   : > { %1815 = vmatmul.mubr.bf16.vlgmr.msra.gmra.mrb[4].mxu1 %v970_v63 }
 0x3a3   : > { %1854 = vmatprep.mubr.msk.bf16.mxu1 %vm2408_vm0, %v2407_v0  ;;  %1839 = vmatpush3.bf16.msra.mxu1 %v2055_v3 }
 0x3a4   : > { %1840 = vmatprep.subr.bf16.mxu1 %v2407_v0 }
 0x3a7   : > { %1841 = vmatpush3.bf16.msra.mxu1 %v2056_v4 }
 0x3a8   : > { %1842 = vmatprep.subr.bf16.mxu1 %v2407_v0 }
 0x3ab   : > { %1843 = vmatpush3.bf16.msra.mxu1 %v2057_v5 }
 0x3ac   : > { %1844 = vmatprep.subr.bf16.mxu1 %v2407_v0 }
 0x3af   : > { %1845 = vmatpush3.bf16.msra.mxu1 %v2058_v6 }
 0x3b0   : > { %1846 = vmatprep.subr.bf16.mxu1 %v2407_v0 }
 0x3b3   : > { %1847 = vmatpush3.bf16.msra.mxu1 %v2059_v7 }
 0x3b4   : > { %1848 = vmatprep.subr.bf16.mxu1 %v2407_v0 }
 0x3b7   : > { %1849 = vmatpush3.bf16.msra.mxu1 %v2060_v8 }
 0x3b8   : > { %1850 = vmatprep.subr.bf16.mxu1 %v2407_v0 }
 0x3bb   : > { %1851 = vmatpush3.bf16.msra.mxu1 %v2061_v17 }
 0x3bc   : > { %1852 = vmatprep.subr.bf16.mxu1 %v2407_v0 }
 0x3bf   : > { %1853 = vmatpush3.bf16.msra.mxu1 %v2062_v18 }
 0x475   : > { %v1076_v10 = vpop.f32.mrb[4].mxu1 }
 0x476   : > { %v1077_v11 = vadd.f32 %v1635_v9, %v1076_v10  ;;  %v1816_v12 = vpop.f32.mrb[5].mxu1 }
 0x477   : > { %v1079_v13 = vpop.f32.mrb[6].mxu1 }
 0x478   : > { %v1082_v14 = vmax.f32 %v1077_v11, 0.0  ;;  %v1817_v15 = vpop.f32.mrb[7].mxu1 }
 0x47a   : > { %v1083_v16 = vpack.c.bf16 %v1082_v14, %v1082_v14 }
 0x47c   : > { %1835 = vmatmul.mubr.bf16.vlgmr.msra.gmra.mrb[8].mxu0 %v1083_v16 }
 0x47d   : > { %1874 = vmatprep.mubr.msk.bf16.mxu0 %vm2408_vm0, %v2407_v0  ;;  %1859 = vmatpush3.bf16.msra.mxu0 %v2063_v19 }
 0x47e   : > { %1860 = vmatprep.subr.bf16.mxu0 %v2407_v0 }
 0x481   : > { %1861 = vmatpush3.bf16.msra.mxu0 %v2064_v20 }
 0x482   : > { %1862 = vmatprep.subr.bf16.mxu0 %v2407_v0 }
 0x485   : > { %1863 = vmatpush3.bf16.msra.mxu0 %v2065_v21 }
 0x486   : > { %1864 = vmatprep.subr.bf16.mxu0 %v2407_v0 }
 0x489   : > { %1865 = vmatpush3.bf16.msra.mxu0 %v2066_v22 }
 0x48a   : > { %1866 = vmatprep.subr.bf16.mxu0 %v2407_v0 }
 0x48d   : > { %1867 = vmatpush3.bf16.msra.mxu0 %v2067_v23 }
 0x48e   : > { %1868 = vmatprep.subr.bf16.mxu0 %v2407_v0 }
 0x491   : > { %1869 = vmatpush3.bf16.msra.mxu0 %v2068_v24 }
 0x492   : > { %1870 = vmatprep.subr.bf16.mxu0 %v2407_v0 }
 0x495   : > { %1871 = vmatpush3.bf16.msra.mxu0 %v2069_v33 }
 0x496   : > { %1872 = vmatprep.subr.bf16.mxu0 %v2407_v0  ;;  %v1662_v0 = vld [vmem:[%s3019_s21] ss:$0 sm:$0xff] }
 0x499   : > { %1873 = vmatpush3.bf16.msra.mxu0 %v2070_v34 }
 0x54f   : > { %v1189_v26 = vpop.f32.mrb[8].mxu0 }
 0x550   : > { %v1190_v27 = vadd.f32 %v1644_v25, %v1189_v26  ;;  %v1836_v28 = vpop.f32.mrb[9].mxu0 }
 0x551   : > { %v1192_v29 = vpop.f32.mrb[10].mxu0 }
 0x552   : > { %v1195_v30 = vmax.f32 %v1190_v27, 0.0  ;;  %v1837_v31 = vpop.f32.mrb[11].mxu0 }
 0x554   : > { %v1196_v32 = vpack.c.bf16 %v1195_v30, %v1195_v30 }
 0x556   : > { %1855 = vmatmul.mubr.bf16.vlgmr.msra.gmra.mrb[8].mxu1 %v1196_v32 }
 0x629   : > { %v1302_v36 = vpop.f32.mrb[8].mxu1 }
 0x62a   : > { %v1303_v37 = vadd.f32 %v1653_v35, %v1302_v36  ;;  %v1856_v38 = vpop.f32.mrb[9].mxu1 }
 0x62b   : > { %v1305_v39 = vpop.f32.mrb[10].mxu1 }
 0x62c   : > { %v1308_v40 = vmax.f32 %v1303_v37, 0.0  ;;  %v1857_v41 = vpop.f32.mrb[11].mxu1 }
 0x62e   : > { %v1311_v42 = vpack.c.bf16 %v1308_v40, %v1308_v40 }
 0x630   : > { %1875 = vmatmul.mubr.bf16.vlgmr.msra.gmra.mrb[12].mxu0 %v1311_v42 }
 0x703   : > { %v1417_v43 = vpop.f32.mrb[12].mxu0 }
 0x704   : > { %v1418_v44 = vadd.f32 %v1662_v0, %v1417_v43  ;;  %v1876_v45 = vpop.f32.mrb[13].mxu0 }
 0x705   : > { %v1420_v46 = vpop.f32.mrb[14].mxu0 }
 0x706   : > { %1423 = vst [vmem:[%s625_s28] sm:$0xff] %v1418_v44  ;;  %v1877_v47 = vpop.f32.mrb[15].mxu0 }
 0x707   : > { %2310 = shalt.err (!%p2307_p8)
}
 0x708   : > { %s2311_s8 = scalar_lea.hbm %s2917_s2, 128  ;;  %s2315_s12 = scalar_lea.hbm %s3020_s26, 256 }
 0x709   : > { %p2312_p3 = scmp.ne.s32.totalorder %s2917_s2, %s2311_s8  ;;  %p2316_p0 = scmp.lt.u32.totalorder %s2917_s2, %s3020_s26 }
 0x70a   : > { %p2317_p11 = scmp.lt.u32.totalorder %s2315_s12, %s2311_s8  ;;  %p2319_p6 = scmp.lt.u32.totalorder %s2311_s8, %s2917_s2 }
 0x70b   : > { %p2313_p12 = pnand %p2312_p3, %p3021_p5 }
 0x70c   : > { %p2318_p7 = por %p2317_p11, %p2316_p0 }
 0x70d   : > { %p2314_p13 = pneg %p2313_p12 }
 0x70e   : > { %p2320_p10 = por %p2319_p6, %p2318_p7 }
 0x710   : > { %p2321_p1 = pnand %p2320_p10, %p2314_p13 }
 0x712   : > { %2324 = shalt.err (!%p2321_p1)
}
 0x713   : > { %1908 = dma.vmem_to_hbm [thread:$0]  (%p3021_p5), %s2919_s1, 128, %s2917_s2, %s1425_s15  }
 0x714 PF: > { %s1451_s25 = sand.u32 1, %s2375_s18   ;;  %p3022_p2 = scmp.ne.s32.totalorder %s3008_s30, 0 }
 0x715   : > { %p3023_p4 = scmp.ge.s32.totalorder %s2395_s23, 2  ;;  %s1452_s10 = scalar_lea.sflag [#allocation5], %s1451_s25 }
 0x717   : > { %p1937_p9 = pnand %p3023_p4, %p3022_p2 }
 0x719   : > { %2370 = dma.done.wait (!%p1937_p9), %s1452_s10, 128  }
 0x71a   : > { %2372 = vsyncadd (!%p1937_p9), %s1452_s10, 4294967168  ;;  %s35_s23 = sadd.s32 1, %s2395_s23   ;;  %s3024_s18 = smov %s2379_s19 }
 0x71b   : > { %p32_p8 = scmp.ge.s32.totalorder %s35_s23, 4   ;;  %s3025_s19 = smov %s2383_s20 }
 0x71c   : > { %s3026_s20 = smov %s2742_s27  ;;  %s3027_s21 = smov %s2391_s22 }
 0x71d   : > { %s3028_s22 = smov %s3030_s29  ;;  %34 = sbr.rel (!%p32_p8) target bundleno = 20 (0x14), region = 157 }
 0x724   :  { %1457 = vsyncpa [#allocation4], 1 }
 0x725   :  { %1459 = vsyncpa [#allocation4 + $0x1], 1 }
 0x726   :  { %1460 = vsyncpa [#allocation7], 1 }
 0x727   :  { %1461 = vsyncpa [#allocation10], 1 }
 0x728   :  { %1462 = vsyncpa [#allocation13], 1 }
 0x729   :  { %1463 = vsyncpa [#allocation16], 1 }
 0x72a   :  { %1464 = vsyncpa [#allocation5], 1 }
 0x72b   :  { %1466 = vsyncpa [#allocation5 + $0x1], 1 }

// kernel: tpu_custom_call.1
= control target key start
LH: loop header
LB: loop body
LE: loop exit
PB: predicated region body
PF: predicated region fallthrough
CT: control target
= control target key end

     0   :  { %s2966_s0 = inlined_call_operand.hbm [shape: f32[16,128], index: 0, kind: input, shape index: {}]   ;;  %s2967_s1 = inlined_call_operand.hbm [shape: bf16[128,128], index: 1, kind: input, shape index: {}]   ;;  %s2968_s2 = inlined_call_operand.vmem [shape: f32[1,128], index: 2, kind: input, shape index: {}]   ;;  %s2969_s3 = inlined_call_operand.hbm [shape: bf16[128,128], index: 3, kind: input, shape index: {}]   ;;  %s2970_s4 = inlined_call_operand.vmem [shape: f32[1,128], index: 4, kind: input, shape index: {}]   ;;  %s2971_s5 = inlined_call_operand.hbm [shape: bf16[128,128], index: 5, kind: input, shape index: {}]   ;;  %s2972_s6 = inlined_call_operand.vmem [shape: f32[1,128], index: 6, kind: input, shape index: {}]   ;;  %s2973_s7 = inlined_call_operand.hbm [shape: bf16[128,128], index: 7, kind: input, shape index: {}]   ;;  %s2974_s8 = inlined_call_operand.vmem [shape: f32[1,128], index: 8, kind: input, shape index: {}]   ;;  %s2975_s9 = inlined_call_operand.hbm [shape: bf16[128,128], index: 9, kind: input, shape index: {}]   ;;  %s2976_s10 = inlined_call_operand.vmem [shape: f32[1,128], index: 10, kind: input, shape index: {}]   ;;  %s2977_s11 = inlined_call_operand.hbm [shape: bf16[128,128], index: 11, kind: input, shape index: {}]   ;;  %s2978_s12 = inlined_call_operand.vmem [shape: f32[1,128], index: 12, kind: input, shape index: {}]   ;;  %s2979_s13 = inlined_call_operand.hbm [shape: bf16[128,128], index: 13, kind: input, shape index: {}]   ;;  %s2980_s14 = inlined_call_operand.vmem [shape: f32[1,128], index: 14, kind: input, shape index: {}]   ;;  %s2981_s15 = inlined_call_operand.hbm [shape: f32[16,128], index: 15, kind: output, shape index: {}]  }
   0x1   :  { %2988 = sst [smem:[#allocation25_spill]] %s2967_s1 }
   0x2   :  { %2989 = sst [smem:[#allocation26_spill]] %s2968_s2 }
   0x3   :  { %2990 = sst [smem:[#allocation27_spill]] %s2970_s4 }
   0x4   :  { %2991 = sst [smem:[#allocation28_spill]] %s2972_s6 }
   0x5   :  { %2992 = sst [smem:[#allocation29_spill]] %s2974_s8 }
   0x6   :  { %2993 = sst [smem:[#allocation30_spill]] %s2976_s10 }
   0x7   :  { %2994 = sst [smem:[#allocation31_spill]] %s2978_s12 }
   0x8   :  { %2995 = sst [smem:[#allocation32_spill]] %s2980_s14 }
   0x9   :  { %2996 = sst [smem:[#allocation33_spill]] %s2981_s15 }
   0xa   :  { %20 = vsyncpa [#allocation4], 0 }
   0xb   :  { %22 = vsyncpa [#allocation4 + $0x1], 0 }
   0xc   :  { %23 = vsyncpa [#allocation7], 0 }
   0xd   :  { %24 = vsyncpa [#allocation10], 0 }
   0xe   :  { %25 = vsyncpa [#allocation13], 0 }
   0xf   :  { %26 = vsyncpa [#allocation16], 0 }
  0x10   :  { %27 = vsyncpa [#allocation5], 0 }
  0x11   :  { %29 = vsyncpa [#allocation5 + $0x1], 0  ;;  %s2490_s18 = smov 0   ;;  %s2492_s19 = smov 0  }
  0x12   :  { %s2494_s20 = smov 0   ;;  %s2496_s21 = smov 0  }
  0x13   :  { %s2498_s22 = smov 0   ;;  %s2500_s23 = smov 0  }
  0x14 LB: > { %2997 = sst [smem:[#allocation24_spill]] %s2387_s21  ;;  %s2982_s24 = sadd.s32 4294967295, %s2395_s23   ;;  %s2395_s23 = sphi %s2500_s23, %s35_s23   ;;  %s2391_s22 = sphi %s2498_s22, %s3028_s22   ;;  %s2387_s21 = sphi %s2496_s21, %s3027_s21   ;;  %s2383_s20 = sphi %s2494_s20, %s3026_s20   ;;  %s2379_s19 = sphi %s2492_s19, %s3025_s19   ;;  %s2375_s18 = sphi %s2490_s18, %s3024_s18  }
  0x15   : > { %p1587_p0 = scmp.ge.s32.totalorder %s2395_s23, 1  ;;  %p2524_p1 = scmp.eq.s32.totalorder %s2982_s24, 0 }
  0x16   : > { %p400_p2 = scmp.lt.s32.totalorder %s2395_s23, 3  ;;  %s2397_s27 = smov [#allocation6]  }
  0x17   : > { %s2998_s25 = scalar_select %p2524_p1, 1, 0 }
  0x18   : > { %p2529_p3 = pnand %p1587_p0, %p400_p2  ;;  %s412_s28 = sshll.u32 %s2397_s27, 4  ;;  %s2533_s28 = int_to_ptr.vmem [resolvable:$true] %s412_s28 }
  0x19   : > { %s2398_s30 = smov [#allocation9]   ;;  %s2399_s17 = smov [#allocation12]  }
  0x1a   : > { %s2999_s26 = scalar_select %p2529_p3, 1, 0 }
  0x1b   : > { %p1910_p4 = pneg %p2529_p3  ;;  %s444_s16 = sshll.u32 %s2398_s30, 4  ;;  %s2544_s16 = int_to_ptr.vmem [resolvable:$true] %s444_s16 }
  0x1c   : > { %s2546_s24 = sshll.u32 %s2399_s17, 4  ;;  %s3001_s1 = sld [smem:[#allocation25_spill]]  ;;  %s477_s24 = int_to_ptr.vmem [resolvable:$true] %s2546_s24 }
  0x1d   : > { %p2540_p6 = pnand %p1910_p4, %p2524_p1 }
  0x1f   : > { %p2556_p8 = pneg %p2540_p6 }
  0x22   : > { %s2071_s14 = scalar_lea.hbm %s3001_s1, 1024 }
  0x23   : > { %p2072_p7 = scmp.ne.s32.totalorder %s3001_s1, %s2071_s14  ;;  %p2078_p11 = scmp.lt.u32.totalorder %s2071_s14, %s3001_s1 }
  0x25   : > { %p2074_p9 = pnand %p2556_p8, %p2072_p7 }
  0x27   : > { %p2075_p10 = pneg %p2074_p9 }
  0x29   : > { %p2080_p12 = pnand %p2078_p11, %p2075_p10 }
  0x2b   : > { %2083 = shalt.err (!%p2080_p12)
}
  0x2c   : > { %s2084_s12 = scalar_lea.vmem %s2533_s28, 1024  ;;  %p2092_p4 = scmp.lt.s32.totalorder %s2533_s28, %s2533_s28 }
  0x2d   : > { %p2085_p13 = scmp.ne.s32.totalorder %s2533_s28, %s2084_s12  ;;  %p2093_p5 = scmp.lt.s32.totalorder %s2084_s12, %s2084_s12 }
  0x2f   : > { %p2087_p0 = pnand %p2085_p13, %p2556_p8  ;;  %p2094_p7 = por %p2093_p5, %p2092_p4 }
  0x31   : > { %p2088_p2 = pneg %p2087_p0 }
  0x33   : > { %p2095_p9 = pnand %p2094_p7, %p2088_p2 }
  0x35   : > { %2098 = shalt.err (!%p2095_p9)
}
  0x36   : > { %s2400_s15 = smov 64   ;;  %s2401_s14 = smov 4  }
  0x37   : > { %1913 = dma.hbm_to_vmem [thread:$0]  (!%p2540_p6), %s3001_s1, 1024, %s2533_s28, [#allocation7], %s2400_s15, %s2400_s15, %s2401_s14  }
  0x38   : > { %s2099_s12 = scalar_lea.hbm %s2971_s5, 1024 }
  0x39   : > { %p2100_p5 = scmp.ne.s32.totalorder %s2971_s5, %s2099_s12  ;;  %p2106_p12 = scmp.lt.u32.totalorder %s2099_s12, %s2971_s5 }
  0x3b   : > { %p2102_p10 = pnand %p2100_p5, %p2556_p8 }
  0x3d   : > { %p2103_p11 = pneg %p2102_p10 }
  0x3f   : > { %p2108_p13 = pnand %p2106_p12, %p2103_p11 }
  0x41   : > { %2111 = shalt.err (!%p2108_p13)
}
  0x42   : > { %s2112_s28 = scalar_lea.vmem %s2544_s16, 1024  ;;  %p2120_p7 = scmp.lt.s32.totalorder %s2544_s16, %s2544_s16 }
  0x43   : > { %p2113_p0 = scmp.ne.s32.totalorder %s2544_s16, %s2112_s28  ;;  %p2121_p9 = scmp.lt.s32.totalorder %s2112_s28, %s2112_s28 }
  0x45   : > { %p2115_p2 = pnand %p2113_p0, %p2556_p8  ;;  %p2122_p5 = por %p2121_p9, %p2120_p7 }
  0x47   : > { %p2116_p4 = pneg %p2115_p2 }
  0x49   : > { %p2123_p10 = pnand %p2122_p5, %p2116_p4 }
  0x4b   : > { %2126 = shalt.err (!%p2123_p10)
}
  0x4c   : > { %1919 = dma.hbm_to_vmem [thread:$0]  (!%p2540_p6), %s2971_s5, 1024, %s2544_s16, [#allocation10], %s2400_s15, %s2400_s15, %s2401_s14  }
  0x4d   : > { %s2127_s21 = scalar_lea.hbm %s2975_s9, 1024 }
  0x4e   : > { %p2128_p11 = scmp.ne.s32.totalorder %s2975_s9, %s2127_s21  ;;  %p2134_p0 = scmp.lt.u32.totalorder %s2127_s21, %s2975_s9 }
  0x50   : > { %p2130_p12 = pnand %p2128_p11, %p2556_p8 }
  0x52   : > { %p2131_p13 = pneg %p2130_p12 }
  0x54   : > { %p2136_p2 = pnand %p2134_p0, %p2131_p13 }
  0x56   : > { %2139 = shalt.err (!%p2136_p2)
}
  0x57   : > { %s2140_s28 = scalar_lea.vmem %s477_s24, 1024  ;;  %p2148_p5 = scmp.lt.s32.totalorder %s477_s24, %s477_s24 }
  0x58   : > { %p2141_p4 = scmp.ne.s32.totalorder %s477_s24, %s2140_s28  ;;  %p2149_p10 = scmp.lt.s32.totalorder %s2140_s28, %s2140_s28 }
  0x5a   : > { %p2143_p7 = pnand %p2141_p4, %p2556_p8  ;;  %p2150_p3 = por %p2149_p10, %p2148_p5 }
  0x5c   : > { %p2144_p9 = pneg %p2143_p7 }
  0x5e   : > { %p2151_p1 = pnand %p2150_p3, %p2144_p9 }
  0x60   : > { %2154 = shalt.err (!%p2151_p1)
}
  0x61   : > { %1925 = dma.hbm_to_vmem [thread:$0]  (!%p2540_p6), %s2975_s9, 1024, %s477_s24, [#allocation13], %s2400_s15, %s2400_s15, %s2401_s14  }
  0x62   : > { %s2402_s4 = smov [#allocation8]   ;;  %s2403_s8 = smov [#allocation11]  }
  0x63   : > { %s428_s6 = sshll.u32 %s2402_s4, 4  ;;  %s460_s21 = sshll.u32 %s2403_s8, 4  ;;  %s429_s6 = int_to_ptr.vmem [resolvable:$true] %s428_s6  ;;  %s461_s21 = int_to_ptr.vmem [resolvable:$true] %s460_s21 }
  0x64   : > { %s2155_s17 = scalar_lea.hbm %s2969_s3, 1024 }
  0x65   : > { %p2156_p1 = scmp.ne.s32.totalorder %s2969_s3, %s2155_s17  ;;  %p2162_p12 = scmp.lt.u32.totalorder %s2155_s17, %s2969_s3 }
  0x67   : > { %p2158_p3 = pnand %p2156_p1, %p2556_p8 }
  0x69   : > { %p2159_p11 = pneg %p2158_p3 }
  0x6b   : > { %p2164_p13 = pnand %p2162_p12, %p2159_p11 }
  0x6d   : > { %2167 = shalt.err (!%p2164_p13)
}
  0x6e   : > { %s2168_s24 = scalar_lea.vmem %s429_s6, 1024  ;;  %p2176_p7 = scmp.lt.s32.totalorder %s429_s6, %s429_s6 }
  0x6f   : > { %p2169_p0 = scmp.ne.s32.totalorder %s429_s6, %s2168_s24  ;;  %p2177_p9 = scmp.lt.s32.totalorder %s2168_s24, %s2168_s24 }
  0x71   : > { %p2171_p2 = pnand %p2169_p0, %p2556_p8  ;;  %p2178_p5 = por %p2177_p9, %p2176_p7 }
  0x73   : > { %p2172_p4 = pneg %p2171_p2 }
  0x75   : > { %p2179_p10 = pnand %p2178_p5, %p2172_p4 }
  0x77   : > { %2182 = shalt.err (!%p2179_p10)
}
  0x78   : > { %1916 = dma.hbm_to_vmem [thread:$0]  (!%p2540_p6), %s2969_s3, 1024, %s429_s6, [#allocation7], %s2400_s15, %s2400_s15, %s2401_s14  }
  0x79   : > { %s2183_s27 = scalar_lea.hbm %s2973_s7, 1024 }
  0x7a   : > { %p2184_p1 = scmp.ne.s32.totalorder %s2973_s7, %s2183_s27  ;;  %p2190_p12 = scmp.lt.u32.totalorder %s2183_s27, %s2973_s7 }
  0x7c   : > { %p2186_p3 = pnand %p2184_p1, %p2556_p8 }
  0x7e   : > { %p2187_p11 = pneg %p2186_p3 }
  0x80   : > { %p2192_p13 = pnand %p2190_p12, %p2187_p11 }
  0x82   : > { %2195 = shalt.err (!%p2192_p13)
}
  0x83   : > { %s2196_s16 = scalar_lea.vmem %s461_s21, 1024  ;;  %p2204_p7 = scmp.lt.s32.totalorder %s461_s21, %s461_s21 }
  0x84   : > { %p2197_p0 = scmp.ne.s32.totalorder %s461_s21, %s2196_s16  ;;  %p2205_p9 = scmp.lt.s32.totalorder %s2196_s16, %s2196_s16 }
  0x86   : > { %p2199_p2 = pnand %p2197_p0, %p2556_p8  ;;  %p2206_p5 = por %p2205_p9, %p2204_p7 }
  0x88   : > { %p2200_p4 = pneg %p2199_p2 }
  0x8a   : > { %p2207_p10 = pnand %p2206_p5, %p2200_p4 }
  0x8c   : > { %2210 = shalt.err (!%p2207_p10)
}
  0x8d   : > { %1922 = dma.hbm_to_vmem [thread:$0]  (!%p2540_p6), %s2973_s7, 1024, %s461_s21, [#allocation10], %s2400_s15, %s2400_s15, %s2401_s14  }
  0x8e   : > { %s2404_s1 = smov [#allocation14]   ;;  %s2405_s4 = smov [#allocation15]  }
  0x8f   : > { %s492_s2 = sshll.u32 %s2404_s1, 4  ;;  %s508_s8 = sshll.u32 %s2405_s4, 4  ;;  %s493_s2 = int_to_ptr.vmem [resolvable:$true] %s492_s2  ;;  %s509_s8 = int_to_ptr.vmem [resolvable:$true] %s508_s8 }
  0x90   : > { %s2211_s17 = scalar_lea.hbm %s2977_s11, 1024 }
  0x91   : > { %p2212_p1 = scmp.ne.s32.totalorder %s2977_s11, %s2211_s17  ;;  %p2218_p12 = scmp.lt.u32.totalorder %s2211_s17, %s2977_s11 }
  0x93   : > { %p2214_p3 = pnand %p2212_p1, %p2556_p8 }
  0x95   : > { %p2215_p11 = pneg %p2214_p3 }
  0x97   : > { %p2220_p13 = pnand %p2218_p12, %p2215_p11 }
  0x99   : > { %2223 = shalt.err (!%p2220_p13)
}
  0x9a   : > { %s2224_s21 = scalar_lea.vmem %s493_s2, 1024  ;;  %p2232_p7 = scmp.lt.s32.totalorder %s493_s2, %s493_s2 }
  0x9b   : > { %p2225_p0 = scmp.ne.s32.totalorder %s493_s2, %s2224_s21  ;;  %p2233_p9 = scmp.lt.s32.totalorder %s2224_s21, %s2224_s21 }
  0x9d   : > { %p2227_p2 = pnand %p2225_p0, %p2556_p8  ;;  %p2234_p5 = por %p2233_p9, %p2232_p7 }
  0x9f   : > { %p2228_p4 = pneg %p2227_p2 }
  0xa1   : > { %p2235_p10 = pnand %p2234_p5, %p2228_p4 }
  0xa3   : > { %2238 = shalt.err (!%p2235_p10)
}
  0xa4   : > { %1928 = dma.hbm_to_vmem [thread:$0]  (!%p2540_p6), %s2977_s11, 1024, %s493_s2, [#allocation13], %s2400_s15, %s2400_s15, %s2401_s14  }
  0xa5   : > { %s2239_s30 = scalar_lea.hbm %s2979_s13, 1024 }
  0xa6   : > { %p2240_p1 = scmp.ne.s32.totalorder %s2979_s13, %s2239_s30  ;;  %p2246_p12 = scmp.lt.u32.totalorder %s2239_s30, %s2979_s13 }
  0xa8   : > { %p2242_p3 = pnand %p2240_p1, %p2556_p8 }
  0xaa   : > { %p2243_p11 = pneg %p2242_p3 }
  0xac   : > { %p2248_p13 = pnand %p2246_p12, %p2243_p11 }
  0xae   : > { %2251 = shalt.err (!%p2248_p13)
}
  0xaf   : > { %s2252_s6 = scalar_lea.vmem %s509_s8, 1024  ;;  %p2260_p7 = scmp.lt.s32.totalorder %s509_s8, %s509_s8 }
  0xb0   : > { %p2253_p0 = scmp.ne.s32.totalorder %s509_s8, %s2252_s6  ;;  %p2261_p9 = scmp.lt.s32.totalorder %s2252_s6, %s2252_s6 }
  0xb2   : > { %p2255_p2 = pnand %p2253_p0, %p2556_p8  ;;  %p2262_p5 = por %p2261_p9, %p2260_p7 }
  0xb4   : > { %p2256_p4 = pneg %p2255_p2 }
  0xb6   : > { %p2263_p10 = pnand %p2262_p5, %p2256_p4 }
  0xb8   : > { %2266 = shalt.err (!%p2263_p10)
}
  0xb9   : > { %1931 = dma.hbm_to_vmem [thread:$0]  (!%p2540_p6), %s2979_s13, 1024, %s509_s8, [#allocation16], %s2400_s15, %s2400_s15, %s2401_s14  }
  0xba   : > { %s1586_s10 = sadd.s32 4294967294, %s2395_s23   ;;  %s47_s29 = sadd.s32 1, %s2391_s22 }
  0xbb   : > { %s54_s24 = sadd.s32 1, %s2383_s20  ;;  %p49_p8 = scmp.ge.s32.totalorder %s47_s29, 2 }
  0xbc   : > { %p61_p1 = scmp.ne.s32.totalorder %s2383_s20, %s2379_s19  ;;  %p62_p3 = scmp.eq.s32.totalorder %s2395_s23, 0 }
  0xbd   : > { %p67_p11 = scmp.ne.s32.totalorder %s2379_s19, %s2375_s18  ;;  %s3030_s29 = smov (%p49_p8, %s47_s29), 0 }
  0xbe   : > { %p2722_p12 = por %p62_p3, %p61_p1  ;;  %p3004_p13 = scmp.ne.s32.totalorder %s2998_s25, 0 }
  0xbf   : > { %s51_s14 = ssub.s32 %s2391_s22, %s3030_s29  ;;  %s3006_s8 = sadd.s32 4294967295, %s2395_s23  }
  0xc0   : > { %p2728_p6 = por %p3004_p13, %p67_p11  ;;  %p387_p0 = scmp.eq.s32.totalorder %s3006_s8, 1 }
  0xc1   : > { %p52_p2 = scmp.eq.s32.totalorder %s51_s14, 0  ;;  %p393_p4 = scmp.eq.s32.totalorder %s1586_s10, 1 }
  0xc2   : > { %p2736_p7 = por %p387_p0, %p61_p1  ;;  %p1947_p9 = scmp.lt.s32.totalorder %s2395_s23, 2 }
  0xc3   : > { %s2742_s27 = scalar_select %p52_p2, %s2383_s20, %s54_s24  }
  0xc4   : > { %s3007_s4 = scalar_select %p2736_p7, 1, 0 }
  0xc5   : > { %p2744_p5 = por %p393_p4, %p67_p11  ;;  %s525_s17 = sand.u32 1, %s2383_s20  }
  0xc6   : > { %s1596_s12 = sshll.u32 %s525_s17, 3  ;;  %s1597_s28 = sshll.u32 %s2391_s22, 7 }
  0xc7   : > { %s3008_s30 = scalar_select %p2744_p5, 1, 0 }
  0xc8   : > { %s2753_s2 = scalar_lea.hbm %s2966_s0, %s1597_s28  ;;  %s529_s21 = scalar_lea.vmem [#allocation3], %s1596_s12 }
  0xc9   : > { %s536_s10 = sshll.u32 %s529_s21, 4  ;;  %p2759_p10 = pnand %p1947_p9, %p2722_p12  ;;  %s2755_s10 = int_to_ptr.vmem [resolvable:$true] %s536_s10 }
  0xca   : > { %s526_s14 = scalar_lea.sflag [#allocation4], %s525_s17  ;;  %s2267_s8 = scalar_lea.hbm %s2753_s2, 128 }
  0xcb   : > { %p2268_p8 = scmp.ne.s32.totalorder %s2753_s2, %s2267_s8  ;;  %p2269_p1 = pneg %p2759_p10 }
  0xcc   : > { %s2272_s16 = scalar_lea.hbm %s2966_s0, 256  ;;  %p2273_p12 = scmp.lt.u32.totalorder %s2753_s2, %s2966_s0 }
  0xcd   : > { %p2270_p3 = pnand %p2269_p1, %p2268_p8  ;;  %p2274_p13 = scmp.lt.u32.totalorder %s2272_s16, %s2267_s8 }
  0xce   : > { %p2276_p2 = scmp.lt.u32.totalorder %s2267_s8, %s2753_s2 }
  0xcf   : > { %p2271_p11 = pneg %p2270_p3  ;;  %p2275_p0 = por %p2274_p13, %p2273_p12 }
  0xd1   : > { %p2277_p4 = por %p2276_p2, %p2275_p0 }
  0xd3   : > { %p2278_p9 = pnand %p2277_p4, %p2271_p11 }
  0xd5   : > { %2281 = shalt.err (!%p2278_p9)
}
  0xd6   : > { %s2282_s17 = scalar_lea.vmem %s2755_s10, 128  ;;  %s2406_s21 = smov [#allocation3]  }
  0xd7   : > { %p2283_p8 = scmp.ne.s32.totalorder %s2755_s10, %s2282_s17  ;;  %s2287_s12 = sshll.u32 %s2406_s21, 4  ;;  %s2288_s12 = int_to_ptr.vmem [resolvable:$false] %s2287_s12 }
  0xd8   : > { %s2289_s28 = scalar_lea.vmem %s2288_s12, 256  ;;  %p2290_p7 = scmp.lt.s32.totalorder %s2755_s10, %s2288_s12 }
  0xd9   : > { %p2285_p3 = pnand %p2283_p8, %p2269_p1  ;;  %p2291_p12 = scmp.lt.s32.totalorder %s2289_s28, %s2282_s17 }
  0xdb   : > { %p2286_p5 = pneg %p2285_p3  ;;  %p2292_p13 = por %p2291_p12, %p2290_p7 }
  0xdd   : > { %p2293_p0 = pnand %p2292_p13, %p2286_p5 }
  0xdf   : > { %2296 = shalt.err (!%p2293_p0)
}
  0xe0   : > { %1935 = dma.hbm_to_vmem [thread:$0]  (!%p2759_p10), %s2753_s2, 128, %s2755_s10, %s526_s14  }
  0xe1   : > { %p3010_p11 = scmp.ne.s32.totalorder %s2999_s26, 0 }
  0xe2   : > { %s2791_s8 = sand.u32 (!%p3010_p11), 1, %s2379_s19  }
  0xe3   : > { %545 = sbr.rel (%p3010_p11) target bundleno = 1812 (0x714), region = 80  ;;  %s1599_s16 = sshll.u32 (!%p3010_p11), %s2791_s8, 3 }
  0xe4   : > { %s548_s1 = scalar_lea.sflag (!%p3010_p11), [#allocation4], %s2791_s8  ;;  %s2797_s6 = scalar_lea.vmem (!%p3010_p11), [#allocation3], %s1599_s16 }
  0xea   : > { %2350 = dma.done.wait (%p2728_p6), %s548_s1, 128  }
  0xeb   : > { %2352 = vsyncadd (%p2728_p6), %s548_s1, 4294967168  ;;  %p3011_p7 = scmp.ne.s32.totalorder %s2998_s25, 0 }
  0xed   : > { %2354 = dma.done.wait (%p3011_p7), [#allocation7], 2048  }
  0xee   : > { %2356 = vsyncadd (%p3011_p7), [#allocation7], 4294965248 }
  0xef   : > { %2358 = dma.done.wait (%p3011_p7), [#allocation10], 2048  }
  0xf0   : > { %2360 = vsyncadd (%p3011_p7), [#allocation10], 4294965248 }
  0xf1   : > { %2362 = dma.done.wait (%p3011_p7), [#allocation13], 2048  }
  0xf2   : > { %2364 = vsyncadd (%p3011_p7), [#allocation13], 4294965248 }
  0xf3   : > { %2366 = dma.done.wait (%p3011_p7), [#allocation16], 1024  }
  0xf4   : > { %2368 = vsyncadd (%p3011_p7), [#allocation16], 4294966272  ;;  %v2407_v0 = vmov 0.0   ;;  %vm2408_vm0 = vmmov 0   ;;  %v2015_v1 = vld [vmem:[#allocation6] sm:$0xff]   ;;  %v2016_v2 = vld [vmem:[#allocation6 + $0x8] sm:$0xff]  }
  0xf5   : > { %1738 = vmatprep.subr.bf16.mxu0 %v2407_v0  ;;  %1754 = vmatprep.mubr.msk.bf16.mxu0 %vm2408_vm0, %v2407_v0  ;;  %v2017_v3 = vld [vmem:[#allocation6 + $0x10] sm:$0xff]   ;;  %v2023_v4 = vld [vmem:[#allocation8] sm:$0xff]   ;;  %v2018_v5 = vld [vmem:[#allocation6 + $0x18] sm:$0xff]   ;;  %s3012_s15 = sld [smem:[#allocation26_spill]]  ;;  %s3013_s24 = sld [smem:[#allocation27_spill]] }
  0xf6   : > { %1758 = vmatprep.subr.bf16.mxu1 %v2407_v0  ;;  %1774 = vmatprep.mubr.msk.bf16.mxu1 %vm2408_vm0, %v2407_v0  ;;  %v2024_v6 = vld [vmem:[#allocation8 + $0x8] sm:$0xff]   ;;  %v2019_v7 = vld [vmem:[#allocation6 + $0x20] sm:$0xff]   ;;  %v2025_v8 = vld [vmem:[#allocation8 + $0x10] sm:$0xff]   ;;  %s3014_s21 = sld [smem:[#allocation28_spill]]  ;;  %s3015_s1 = sld [smem:[#allocation29_spill]] }
  0xf7   : > { %1739 = vmatpush3.bf16.msra.mxu0 %v2015_v1  ;;  %1759 = vmatpush3.bf16.msra.mxu1 %v2023_v4  ;;  %v2020_v9 = vld [vmem:[#allocation6 + $0x28] sm:$0xff]   ;;  %v2026_v10 = vld [vmem:[#allocation8 + $0x18] sm:$0xff]   ;;  %v2021_v11 = vld [vmem:[#allocation6 + $0x30] sm:$0xff]   ;;  %s3016_s26 = sld [smem:[#allocation30_spill]]  ;;  %s625_s28 = scalar_lea.vmem [#allocation17], %s1599_s16 }
  0xf8   : > { %1740 = vmatprep.subr.bf16.mxu0 %v2407_v0  ;;  %1760 = vmatprep.subr.bf16.mxu1 %v2407_v0  ;;  %v2027_v12 = vld [vmem:[#allocation8 + $0x20] sm:$0xff]   ;;  %v2022_v13 = vld [vmem:[#allocation6 + $0x38] sm:$0xff]   ;;  %v2028_v15 = vld [vmem:[#allocation8 + $0x28] sm:$0xff]   ;;  %p3021_p5 = scmp.ne.s32.totalorder %s3007_s4, 0  ;;  %s2409_s16 = smov [#allocation17]  }
  0xf9   : > { %v631_v14 = vld [vmem:[%s2797_s6] sm:$0xff]  ;;  %v2031_v19 = vld [vmem:[#allocation9] sm:$0xff]   ;;  %v2032_v20 = vld [vmem:[#allocation9 + $0x8] sm:$0xff]  }
  0xfa   : > { %v632_v16 = vpack.c.bf16 %v631_v14, %v631_v14  ;;  %v2029_v17 = vld [vmem:[#allocation8 + $0x30] sm:$0xff]   ;;  %v2030_v18 = vld [vmem:[#allocation8 + $0x38] sm:$0xff]   ;;  %v2035_v23 = vld [vmem:[#allocation9 + $0x20] sm:$0xff]  }
  0xfb   : > { %1741 = vmatpush3.bf16.msra.mxu0 %v2016_v2  ;;  %1761 = vmatpush3.bf16.msra.mxu1 %v2024_v6  ;;  %v2033_v21 = vld [vmem:[#allocation9 + $0x10] sm:$0xff]   ;;  %v2034_v22 = vld [vmem:[#allocation9 + $0x18] sm:$0xff]   ;;  %v2036_v24 = vld [vmem:[#allocation9 + $0x28] sm:$0xff]  }
  0xfc   : > { %1742 = vmatprep.subr.bf16.mxu0 %v2407_v0  ;;  %1762 = vmatprep.subr.bf16.mxu1 %v2407_v0  ;;  %v1608_v25 = vld [vmem:[%s3012_s15] ss:$0 sm:$0xff]  ;;  %v2038_v33 = vld [vmem:[#allocation9 + $0x38] sm:$0xff]   ;;  %v2039_v34 = vld [vmem:[#allocation11] sm:$0xff]   ;;  %s3017_s15 = sld [smem:[#allocation24_spill]] }
  0xfd   : > { %v2037_v32 = vld [vmem:[#allocation9 + $0x30] sm:$0xff]   ;;  %v2040_v35 = vld [vmem:[#allocation11 + $0x8] sm:$0xff]   ;;  %v2042_v37 = vld [vmem:[#allocation11 + $0x18] sm:$0xff]  }
  0xfe   : > { %v2041_v36 = vld [vmem:[#allocation11 + $0x10] sm:$0xff]   ;;  %v2043_v38 = vld [vmem:[#allocation11 + $0x20] sm:$0xff]   ;;  %v2044_v39 = vld [vmem:[#allocation11 + $0x28] sm:$0xff]  }
  0xff   : > { %1743 = vmatpush3.bf16.msra.mxu0 %v2017_v3  ;;  %1763 = vmatpush3.bf16.msra.mxu1 %v2025_v8  ;;  %v1617_v40 = vld [vmem:[%s3013_s24] ss:$0 sm:$0xff]  ;;  %v2046_v49 = vld [vmem:[#allocation11 + $0x38] sm:$0xff]   ;;  %v2047_v50 = vld [vmem:[#allocation12] sm:$0xff]   ;;  %s3018_s24 = sld [smem:[#allocation31_spill]] }
 0x100   : > { %1744 = vmatprep.subr.bf16.mxu0 %v2407_v0  ;;  %1764 = vmatprep.subr.bf16.mxu1 %v2407_v0  ;;  %v2045_v48 = vld [vmem:[#allocation11 + $0x30] sm:$0xff]   ;;  %v2048_v51 = vld [vmem:[#allocation12 + $0x8] sm:$0xff]   ;;  %v2050_v53 = vld [vmem:[#allocation12 + $0x18] sm:$0xff]  }
 0x101   : > { %v2049_v52 = vld [vmem:[#allocation12 + $0x10] sm:$0xff]   ;;  %v2051_v54 = vld [vmem:[#allocation12 + $0x20] sm:$0xff]   ;;  %v2052_v55 = vld [vmem:[#allocation12 + $0x28] sm:$0xff]  }
 0x102   : > { %v1626_v56 = vld [vmem:[%s3014_s21] ss:$0 sm:$0xff]  ;;  %v2054_v2 = vld [vmem:[#allocation12 + $0x38] sm:$0xff]   ;;  %v2055_v3 = vld [vmem:[#allocation14] sm:$0xff]   ;;  %s3019_s21 = sld [smem:[#allocation32_spill]]  ;;  %s1672_s12 = sshll.u32 %s3017_s15, 7 }
 0x103   : > { %1745 = vmatpush3.bf16.msra.mxu0 %v2018_v5  ;;  %1765 = vmatpush3.bf16.msra.mxu1 %v2026_v10  ;;  %v2053_v1 = vld [vmem:[#allocation12 + $0x30] sm:$0xff]   ;;  %v2056_v4 = vld [vmem:[#allocation14 + $0x8] sm:$0xff]   ;;  %v2058_v6 = vld [vmem:[#allocation14 + $0x18] sm:$0xff]   ;;  %s1425_s15 = scalar_lea.sflag [#allocation5], %s2791_s8 }
 0x104   : > { %1746 = vmatprep.subr.bf16.mxu0 %v2407_v0  ;;  %1766 = vmatprep.subr.bf16.mxu1 %v2407_v0  ;;  %v2057_v5 = vld [vmem:[#allocation14 + $0x10] sm:$0xff]   ;;  %v2060_v8 = vld [vmem:[#allocation14 + $0x28] sm:$0xff]  }
 0x107   : > { %1747 = vmatpush3.bf16.msra.mxu0 %v2019_v7  ;;  %1767 = vmatpush3.bf16.msra.mxu1 %v2027_v12  ;;  %v2059_v7 = vld [vmem:[#allocation14 + $0x20] sm:$0xff]  }
 0x108   : > { %1748 = vmatprep.subr.bf16.mxu0 %v2407_v0  ;;  %1768 = vmatprep.subr.bf16.mxu1 %v2407_v0 }
 0x10b   : > { %1749 = vmatpush3.bf16.msra.mxu0 %v2020_v9  ;;  %1769 = vmatpush3.bf16.msra.mxu1 %v2028_v15  ;;  %v1635_v9 = vld [vmem:[%s3015_s1] ss:$0 sm:$0xff]  ;;  %s1439_s1 = sshll.u32 %s625_s28, 4  ;;  %s2919_s1 = int_to_ptr.vmem [resolvable:$true] %s1439_s1 }
 0x10c   : > { %1750 = vmatprep.subr.bf16.mxu0 %v2407_v0  ;;  %1770 = vmatprep.subr.bf16.mxu1 %v2407_v0  ;;  %s2297_s10 = scalar_lea.vmem %s2919_s1, 128 }
 0x10d   : > { %p2298_p6 = scmp.ne.s32.totalorder %s2919_s1, %s2297_s10 }
 0x10f   : > { %1751 = vmatpush3.bf16.msra.mxu0 %v2021_v11  ;;  %1771 = vmatpush3.bf16.msra.mxu1 %v2029_v17  ;;  %v2061_v17 = vld [vmem:[#allocation14 + $0x30] sm:$0xff]   ;;  %p2299_p10 = pnand %p2298_p6, %p3021_p5 }
 0x110   : > { %1752 = vmatprep.subr.bf16.mxu0 %v2407_v0  ;;  %1772 = vmatprep.subr.bf16.mxu1 %v2407_v0 }
 0x111   : > { %p2300_p1 = pneg %p2299_p10 }
 0x113   : > { %1753 = vmatpush3.bf16.msra.mxu0 %v2022_v13  ;;  %1773 = vmatpush3.bf16.msra.mxu1 %v2030_v18  ;;  %v2062_v18 = vld [vmem:[#allocation14 + $0x38] sm:$0xff]  }
 0x114   : > { %1778 = vmatprep.subr.bf16.mxu0 %v2407_v0  ;;  %1798 = vmatprep.subr.bf16.mxu1 %v2407_v0 }
 0x116   : > { %1755 = vmatmul.mubr.bf16.vlgmr.msra.gmra.mrb[0].mxu0 %v632_v16 }
 0x117   : > { %1794 = vmatprep.mubr.msk.bf16.mxu0 %vm2408_vm0, %v2407_v0  ;;  %1779 = vmatpush3.bf16.msra.mxu0 %v2031_v19  ;;  %v2063_v19 = vld [vmem:[#allocation15] sm:$0xff]  }
 0x118   : > { %1780 = vmatprep.subr.bf16.mxu0 %v2407_v0 }
 0x11b   : > { %1781 = vmatpush3.bf16.msra.mxu0 %v2032_v20  ;;  %v2064_v20 = vld [vmem:[#allocation15 + $0x8] sm:$0xff]  }
 0x11c   : > { %1782 = vmatprep.subr.bf16.mxu0 %v2407_v0 }
 0x11f   : > { %1783 = vmatpush3.bf16.msra.mxu0 %v2033_v21  ;;  %v2065_v21 = vld [vmem:[#allocation15 + $0x10] sm:$0xff]  }
 0x120   : > { %1784 = vmatprep.subr.bf16.mxu0 %v2407_v0 }
 0x123   : > { %1785 = vmatpush3.bf16.msra.mxu0 %v2034_v22  ;;  %v2066_v22 = vld [vmem:[#allocation15 + $0x18] sm:$0xff]  }
 0x124   : > { %1786 = vmatprep.subr.bf16.mxu0 %v2407_v0 }
 0x127   : > { %1787 = vmatpush3.bf16.msra.mxu0 %v2035_v23  ;;  %v2067_v23 = vld [vmem:[#allocation15 + $0x20] sm:$0xff]  }
 0x128   : > { %1788 = vmatprep.subr.bf16.mxu0 %v2407_v0 }
 0x12b   : > { %1789 = vmatpush3.bf16.msra.mxu0 %v2036_v24  ;;  %v2068_v24 = vld [vmem:[#allocation15 + $0x28] sm:$0xff]  }
 0x12c   : > { %1790 = vmatprep.subr.bf16.mxu0 %v2407_v0 }
 0x12f   : > { %1791 = vmatpush3.bf16.msra.mxu0 %v2037_v32 }
 0x130   : > { %1792 = vmatprep.subr.bf16.mxu0 %v2407_v0 }
 0x133   : > { %1793 = vmatpush3.bf16.msra.mxu0 %v2038_v33  ;;  %v2069_v33 = vld [vmem:[#allocation15 + $0x30] sm:$0xff]  }
 0x134   : > { %1818 = vmatprep.subr.bf16.mxu0 %v2407_v0 }
 0x1e9   : > { %v738_v26 = vpop.f32.mrb[0].mxu0 }
 0x1ea   : > { %v739_v27 = vadd.f32 %v1608_v25, %v738_v26  ;;  %v1756_v28 = vpop.f32.mrb[1].mxu0  ;;  %v1644_v25 = vld [vmem:[%s3016_s26] ss:$0 sm:$0xff]  ;;  %s3020_s26 = sld [smem:[#allocation33_spill]] }
 0x1eb   : > { %v741_v29 = vpop.f32.mrb[2].mxu0 }
 0x1ec   : > { %v744_v30 = vpack.c.bf16 %v739_v27, %v739_v27  ;;  %v1757_v31 = vpop.f32.mrb[3].mxu0 }
 0x1ee   : > { %1775 = vmatmul.mubr.bf16.vlgmr.msra.gmra.mrb[0].mxu1 %v744_v30 }
 0x1ef   : > { %1814 = vmatprep.mubr.msk.bf16.mxu1 %vm2408_vm0, %v2407_v0  ;;  %1799 = vmatpush3.bf16.msra.mxu1 %v2039_v34  ;;  %v2070_v34 = vld [vmem:[#allocation15 + $0x38] sm:$0xff]  }
 0x1f0   : > { %1800 = vmatprep.subr.bf16.mxu1 %v2407_v0  ;;  %s2917_s2 = scalar_lea.hbm %s3020_s26, %s1672_s12 }
 0x1f3   : > { %1801 = vmatpush3.bf16.msra.mxu1 %v2040_v35  ;;  %v1653_v35 = vld [vmem:[%s3018_s24] ss:$0 sm:$0xff]  ;;  %s2301_s24 = sshll.u32 %s2409_s16, 4  ;;  %s2302_s24 = int_to_ptr.vmem [resolvable:$false] %s2301_s24 }
 0x1f4   : > { %1802 = vmatprep.subr.bf16.mxu1 %v2407_v0  ;;  %s2303_s14 = scalar_lea.vmem %s2302_s24, 256  ;;  %p2304_p2 = scmp.lt.s32.totalorder %s2919_s1, %s2302_s24 }
 0x1f5   : > { %p2305_p4 = scmp.lt.s32.totalorder %s2303_s14, %s2297_s10 }
 0x1f7   : > { %1803 = vmatpush3.bf16.msra.mxu1 %v2041_v36  ;;  %p2306_p9 = por %p2305_p4, %p2304_p2 }
 0x1f8   : > { %1804 = vmatprep.subr.bf16.mxu1 %v2407_v0 }
 0x1f9   : > { %p2307_p8 = pnand %p2306_p9, %p2300_p1 }
 0x1fb   : > { %1805 = vmatpush3.bf16.msra.mxu1 %v2042_v37 }
 0x1fc   : > { %1806 = vmatprep.subr.bf16.mxu1 %v2407_v0 }
 0x1ff   : > { %1807 = vmatpush3.bf16.msra.mxu1 %v2043_v38 }
 0x200   : > { %1808 = vmatprep.subr.bf16.mxu1 %v2407_v0 }
 0x203   : > { %1809 = vmatpush3.bf16.msra.mxu1 %v2044_v39 }
 0x204   : > { %1810 = vmatprep.subr.bf16.mxu1 %v2407_v0 }
 0x207   : > { %1811 = vmatpush3.bf16.msra.mxu1 %v2045_v48 }
 0x208   : > { %1812 = vmatprep.subr.bf16.mxu1 %v2407_v0 }
 0x20b   : > { %1813 = vmatpush3.bf16.msra.mxu1 %v2046_v49 }
 0x20c   : > { %1838 = vmatprep.subr.bf16.mxu1 %v2407_v0 }
 0x2c1   : > { %v850_v41 = vpop.f32.mrb[0].mxu1 }
 0x2c2   : > { %v851_v42 = vadd.f32 %v1617_v40, %v850_v41  ;;  %v1776_v43 = vpop.f32.mrb[1].mxu1 }
 0x2c3   : > { %v853_v44 = vpop.f32.mrb[2].mxu1 }
 0x2c4   : > { %v856_v45 = vmax.f32 %v851_v42, 0.0  ;;  %v1777_v46 = vpop.f32.mrb[3].mxu1 }
 0x2c6   : > { %v857_v47 = vpack.c.bf16 %v856_v45, %v856_v45 }
 0x2c8   : > { %1795 = vmatmul.mubr.bf16.vlgmr.msra.gmra.mrb[4].mxu0 %v857_v47 }
 0x2c9   : > { %1834 = vmatprep.mubr.msk.bf16.mxu0 %vm2408_vm0, %v2407_v0  ;;  %1819 = vmatpush3.bf16.msra.mxu0 %v2047_v50 }
 0x2ca   : > { %1820 = vmatprep.subr.bf16.mxu0 %v2407_v0 }
 0x2cd   : > { %1821 = vmatpush3.bf16.msra.mxu0 %v2048_v51 }
 0x2ce   : > { %1822 = vmatprep.subr.bf16.mxu0 %v2407_v0 }
 0x2d1   : > { %1823 = vmatpush3.bf16.msra.mxu0 %v2049_v52 }
 0x2d2   : > { %1824 = vmatprep.subr.bf16.mxu0 %v2407_v0 }
 0x2d5   : > { %1825 = vmatpush3.bf16.msra.mxu0 %v2050_v53 }
 0x2d6   : > { %1826 = vmatprep.subr.bf16.mxu0 %v2407_v0 }
 0x2d9   : > { %1827 = vmatpush3.bf16.msra.mxu0 %v2051_v54 }
 0x2da   : > { %1828 = vmatprep.subr.bf16.mxu0 %v2407_v0 }
 0x2dd   : > { %1829 = vmatpush3.bf16.msra.mxu0 %v2052_v55 }
 0x2de   : > { %1830 = vmatprep.subr.bf16.mxu0 %v2407_v0 }
 0x2e1   : > { %1831 = vmatpush3.bf16.msra.mxu0 %v2053_v1 }
 0x2e2   : > { %1832 = vmatprep.subr.bf16.mxu0 %v2407_v0 }
 0x2e5   : > { %1833 = vmatpush3.bf16.msra.mxu0 %v2054_v2 }
 0x2e6   : > { %1858 = vmatprep.subr.bf16.mxu0 %v2407_v0 }
 0x39b   : > { %v963_v57 = vpop.f32.mrb[4].mxu0 }
 0x39c   : > { %v964_v58 = vadd.f32 %v1626_v56, %v963_v57  ;;  %v1796_v59 = vpop.f32.mrb[5].mxu0 }
 0x39d   : > { %v966_v60 = vpop.f32.mrb[6].mxu0 }
 0x39e   : > { %v969_v61 = vmax.f32 %v964_v58, 0.0  ;;  %v1797_v62 = vpop.f32.mrb[7].mxu0 }
 0x3a0   : > { %v970_v63 = vpack.c.bf16 %v969_v61, %v969_v61 }
 0x3a2   : > { %1815 = vmatmul.mubr.bf16.vlgmr.msra.gmra.mrb[4].mxu1 %v970_v63 }
 0x3a3   : > { %1854 = vmatprep.mubr.msk.bf16.mxu1 %vm2408_vm0, %v2407_v0  ;;  %1839 = vmatpush3.bf16.msra.mxu1 %v2055_v3 }
 0x3a4   : > { %1840 = vmatprep.subr.bf16.mxu1 %v2407_v0 }
 0x3a7   : > { %1841 = vmatpush3.bf16.msra.mxu1 %v2056_v4 }
 0x3a8   : > { %1842 = vmatprep.subr.bf16.mxu1 %v2407_v0 }
 0x3ab   : > { %1843 = vmatpush3.bf16.msra.mxu1 %v2057_v5 }
 0x3ac   : > { %1844 = vmatprep.subr.bf16.mxu1 %v2407_v0 }
 0x3af   : > { %1845 = vmatpush3.bf16.msra.mxu1 %v2058_v6 }
 0x3b0   : > { %1846 = vmatprep.subr.bf16.mxu1 %v2407_v0 }
 0x3b3   : > { %1847 = vmatpush3.bf16.msra.mxu1 %v2059_v7 }
 0x3b4   : > { %1848 = vmatprep.subr.bf16.mxu1 %v2407_v0 }
 0x3b7   : > { %1849 = vmatpush3.bf16.msra.mxu1 %v2060_v8 }
 0x3b8   : > { %1850 = vmatprep.subr.bf16.mxu1 %v2407_v0 }
 0x3bb   : > { %1851 = vmatpush3.bf16.msra.mxu1 %v2061_v17 }
 0x3bc   : > { %1852 = vmatprep.subr.bf16.mxu1 %v2407_v0 }
 0x3bf   : > { %1853 = vmatpush3.bf16.msra.mxu1 %v2062_v18 }
 0x475   : > { %v1076_v10 = vpop.f32.mrb[4].mxu1 }
 0x476   : > { %v1077_v11 = vadd.f32 %v1635_v9, %v1076_v10  ;;  %v1816_v12 = vpop.f32.mrb[5].mxu1 }
 0x477   : > { %v1079_v13 = vpop.f32.mrb[6].mxu1 }
 0x478   : > { %v1082_v14 = vmax.f32 %v1077_v11, 0.0  ;;  %v1817_v15 = vpop.f32.mrb[7].mxu1 }
 0x47a   : > { %v1083_v16 = vpack.c.bf16 %v1082_v14, %v1082_v14 }
 0x47c   : > { %1835 = vmatmul.mubr.bf16.vlgmr.msra.gmra.mrb[8].mxu0 %v1083_v16 }
 0x47d   : > { %1874 = vmatprep.mubr.msk.bf16.mxu0 %vm2408_vm0, %v2407_v0  ;;  %1859 = vmatpush3.bf16.msra.mxu0 %v2063_v19 }
 0x47e   : > { %1860 = vmatprep.subr.bf16.mxu0 %v2407_v0 }
 0x481   : > { %1861 = vmatpush3.bf16.msra.mxu0 %v2064_v20 }
 0x482   : > { %1862 = vmatprep.subr.bf16.mxu0 %v2407_v0 }
 0x485   : > { %1863 = vmatpush3.bf16.msra.mxu0 %v2065_v21 }
 0x486   : > { %1864 = vmatprep.subr.bf16.mxu0 %v2407_v0 }
 0x489   : > { %1865 = vmatpush3.bf16.msra.mxu0 %v2066_v22 }
 0x48a   : > { %1866 = vmatprep.subr.bf16.mxu0 %v2407_v0 }
 0x48d   : > { %1867 = vmatpush3.bf16.msra.mxu0 %v2067_v23 }
 0x48e   : > { %1868 = vmatprep.subr.bf16.mxu0 %v2407_v0 }
 0x491   : > { %1869 = vmatpush3.bf16.msra.mxu0 %v2068_v24 }
 0x492   : > { %1870 = vmatprep.subr.bf16.mxu0 %v2407_v0 }
 0x495   : > { %1871 = vmatpush3.bf16.msra.mxu0 %v2069_v33 }
 0x496   : > { %1872 = vmatprep.subr.bf16.mxu0 %v2407_v0  ;;  %v1662_v0 = vld [vmem:[%s3019_s21] ss:$0 sm:$0xff] }
 0x499   : > { %1873 = vmatpush3.bf16.msra.mxu0 %v2070_v34 }
 0x54f   : > { %v1189_v26 = vpop.f32.mrb[8].mxu0 }
 0x550   : > { %v1190_v27 = vadd.f32 %v1644_v25, %v1189_v26  ;;  %v1836_v28 = vpop.f32.mrb[9].mxu0 }
 0x551   : > { %v1192_v29 = vpop.f32.mrb[10].mxu0 }
 0x552   : > { %v1195_v30 = vmax.f32 %v1190_v27, 0.0  ;;  %v1837_v31 = vpop.f32.mrb[11].mxu0 }
 0x554   : > { %v1196_v32 = vpack.c.bf16 %v1195_v30, %v1195_v30 }
 0x556   : > { %1855 = vmatmul.mubr.bf16.vlgmr.msra.gmra.mrb[8].mxu1 %v1196_v32 }
 0x629   : > { %v1302_v36 = vpop.f32.mrb[8].mxu1 }
 0x62a   : > { %v1303_v37 = vadd.f32 %v1653_v35, %v1302_v36  ;;  %v1856_v38 = vpop.f32.mrb[9].mxu1 }
 0x62b   : > { %v1305_v39 = vpop.f32.mrb[10].mxu1 }
 0x62c   : > { %v1308_v40 = vmax.f32 %v1303_v37, 0.0  ;;  %v1857_v41 = vpop.f32.mrb[11].mxu1 }
 0x62e   : > { %v1311_v42 = vpack.c.bf16 %v1308_v40, %v1308_v40 }
 0x630   : > { %1875 = vmatmul.mubr.bf16.vlgmr.msra.gmra.mrb[12].mxu0 %v1311_v42 }
 0x703   : > { %v1417_v43 = vpop.f32.mrb[12].mxu0 }
 0x704   : > { %v1418_v44 = vadd.f32 %v1662_v0, %v1417_v43  ;;  %v1876_v45 = vpop.f32.mrb[13].mxu0 }
 0x705   : > { %v1420_v46 = vpop.f32.mrb[14].mxu0 }
 0x706   : > { %1423 = vst [vmem:[%s625_s28] sm:$0xff] %v1418_v44  ;;  %v1877_v47 = vpop.f32.mrb[15].mxu0 }
 0x707   : > { %2310 = shalt.err (!%p2307_p8)
}
 0x708   : > { %s2311_s8 = scalar_lea.hbm %s2917_s2, 128  ;;  %s2315_s12 = scalar_lea.hbm %s3020_s26, 256 }
 0x709   : > { %p2312_p3 = scmp.ne.s32.totalorder %s2917_s2, %s2311_s8  ;;  %p2316_p0 = scmp.lt.u32.totalorder %s2917_s2, %s3020_s26 }
 0x70a   : > { %p2317_p11 = scmp.lt.u32.totalorder %s2315_s12, %s2311_s8  ;;  %p2319_p6 = scmp.lt.u32.totalorder %s2311_s8, %s2917_s2 }
 0x70b   : > { %p2313_p12 = pnand %p2312_p3, %p3021_p5 }
 0x70c   : > { %p2318_p7 = por %p2317_p11, %p2316_p0 }
 0x70d   : > { %p2314_p13 = pneg %p2313_p12 }
 0x70e   : > { %p2320_p10 = por %p2319_p6, %p2318_p7 }
 0x710   : > { %p2321_p1 = pnand %p2320_p10, %p2314_p13 }
 0x712   : > { %2324 = shalt.err (!%p2321_p1)
}
 0x713   : > { %1908 = dma.vmem_to_hbm [thread:$0]  (%p3021_p5), %s2919_s1, 128, %s2917_s2, %s1425_s15  }
 0x714 PF: > { %s1451_s25 = sand.u32 1, %s2375_s18   ;;  %p3022_p2 = scmp.ne.s32.totalorder %s3008_s30, 0 }
 0x715   : > { %p3023_p4 = scmp.ge.s32.totalorder %s2395_s23, 2  ;;  %s1452_s10 = scalar_lea.sflag [#allocation5], %s1451_s25 }
 0x717   : > { %p1937_p9 = pnand %p3023_p4, %p3022_p2 }
 0x719   : > { %2370 = dma.done.wait (!%p1937_p9), %s1452_s10, 128  }
 0x71a   : > { %2372 = vsyncadd (!%p1937_p9), %s1452_s10, 4294967168  ;;  %s35_s23 = sadd.s32 1, %s2395_s23   ;;  %s3024_s18 = smov %s2379_s19 }
 0x71b   : > { %p32_p8 = scmp.ge.s32.totalorder %s35_s23, 4   ;;  %s3025_s19 = smov %s2383_s20 }
 0x71c   : > { %s3026_s20 = smov %s2742_s27  ;;  %s3027_s21 = smov %s2391_s22 }
 0x71d   : > { %s3028_s22 = smov %s3030_s29  ;;  %34 = sbr.rel (!%p32_p8) target bundleno = 20 (0x14), region = 157 }
 0x724   :  { %1457 = vsyncpa [#allocation4], 1 }
 0x725   :  { %1459 = vsyncpa [#allocation4 + $0x1], 1 }
 0x726   :  { %1460 = vsyncpa [#allocation7], 1 }
 0x727   :  { %1461 = vsyncpa [#allocation10], 1 }
 0x728   :  { %1462 = vsyncpa [#allocation13], 1 }
 0x729   :  { %1463 = vsyncpa [#allocation16], 1 }
 0x72a   :  { %1464 = vsyncpa [#allocation5], 1 }
 0x72b   :  { %1466 = vsyncpa [#allocation5 + $0x1], 1 }

</bundles_post_ra>
